<compile_context>
chip_gen: v6e
topology: v6e:2x2x1
jax: 0.10.0
libtpu: 0.0.40
codegen_flags: <defaults>
</compile_context>

<pallas_src>
import functools

import jax
import jax.numpy as jnp
from jax.experimental import pallas as pl
from jax.experimental.pallas import tpu as pltpu


def _rotary_tables(n, dim_head):
    """cos/sin tables of shape (n, dim_head) + the rotate_half matrix (dh, dh)."""
    rotary_dim = dim_head // 2  # RotaryEmbedding(dim=dim_head // 2)
    inv_freq = 1.0 / (
        10000.0 ** (jnp.arange(0, rotary_dim, 2, dtype=jnp.float32) / rotary_dim)
    )
    t = jnp.arange(n, dtype=jnp.float32)
    freqs = t[:, None] * inv_freq[None, :]          # (n, rotary_dim // 2)
    freqs = jnp.repeat(freqs, 2, axis=-1)           # (n, rot_dim) interleaved
    rot_dim = freqs.shape[-1]
    cos = jnp.concatenate(
        [jnp.cos(freqs), jnp.ones((n, dim_head - rot_dim), jnp.float32)], axis=-1)
    sin = jnp.concatenate(
        [jnp.sin(freqs), jnp.zeros((n, dim_head - rot_dim), jnp.float32)], axis=-1)
    # rotate_half (interleaved pairs) as a matmul in channel-major layout:
    #   rotate_half_channels(t) = rot @ t   for t of shape (dim_head, n)
    rot = jnp.zeros((dim_head, dim_head), jnp.float32)
    idx = jnp.arange(rot_dim // 2)
    rot = rot.at[2 * idx, 2 * idx + 1].set(-1.0)
    rot = rot.at[2 * idx + 1, 2 * idx].set(1.0)
    return cos, sin, rot


def _attention_kernel(x_ref, w_aug_ref, cos_ref, sin_ref, wout_ref, bout_ref,
                      o_ref, k_ref, v_ref, *, heads, dim_head, tq):
    """One (batch, q-block) grid step.

    x_ref     : (dim, N)        bf16   full sequence for this batch element
    w_aug_ref : (5*hidden, dim) bf16   [Wq*s ; rot@Wq*s ; Wk ; rot@Wk ; Wv]
    cos_ref   : (hidden, N)     f32    per-head-tiled rotary cos (channel-major)
    sin_ref   : (hidden, N)     f32
    wout_ref  : (dim, hidden)   bf16
    bout_ref  : (dim, 1)        f32
    o_ref     : (dim, tq)       f32    output q-block
    k_ref     : (heads, dh, N)      bf16 scratch: rotated keys
    v_ref     : (heads, dh + 1, N)  bf16 scratch: values + ones row (row sums)
    """
    hidden = heads * dim_head
    n = x_ref.shape[-1]
    qi = pl.program_id(1)

    w_aug = w_aug_ref[...]                                        # (5*hidden, dim)

    # ---- once per batch element: project K/V, rotate K, stash as bf16 ----
    @pl.when(qi == 0)
    def _():
        x = x_ref[...]                                            # (dim, N) bf16
        kvr = jnp.dot(w_aug[2 * hidden:], x,
                      preferred_element_type=jnp.float32)         # (3*hidden, N)
        k_rot = (kvr[:hidden] * cos_ref[...]
                 + kvr[hidden:2 * hidden] * sin_ref[...])         # (hidden, N)
        v = kvr[2 * hidden:]                                      # (hidden, N)
        ones_row = jnp.ones((1, n), jnp.float32)
        for h in range(heads):
            k_ref[h] = k_rot[h * dim_head:(h + 1) * dim_head].astype(k_ref.dtype)
            v_ref[h] = jnp.concatenate(
                [v[h * dim_head:(h + 1) * dim_head], ones_row], axis=0
            ).astype(v_ref.dtype)

    # ---- per q-block: project + rotate Q (scale already folded into W) ----
    q0 = pl.multiple_of(qi * tq, tq)
    xq = x_ref[:, pl.ds(q0, tq)]                                  # (dim, tq) bf16
    qproj = jnp.dot(w_aug[:2 * hidden], xq,
                    preferred_element_type=jnp.float32)           # (2*hidden, tq)
    cos_q = cos_ref[:, pl.ds(q0, tq)]
    sin_q = sin_ref[:, pl.ds(q0, tq)]
    q_rot = qproj[:hidden] * cos_q + qproj[hidden:] * sin_q       # (hidden, tq) f32

    # TODO(synk): switch this static head loop to lax.fori_loop(unroll=True)
    # if heads grows well beyond 4.
    outs = []
    for h in range(heads):
        qh = q_rot[h * dim_head:(h + 1) * dim_head].astype(jnp.bfloat16)   # (dh, tq)
        kh = k_ref[h]                                                      # (dh, N)
        sim = jax.lax.dot_general(qh, kh, (((0,), (0,)), ((), ())),
                                  preferred_element_type=jnp.float32)      # (tq, N)
        e = jnp.exp(sim - jnp.max(sim, axis=-1, keepdims=True))            # (tq, N)
        eb = e.astype(jnp.bfloat16)
        # out_aug[d, i] = sum_j v_aug[d, j] * e[i, j]; last row is the row sum.
        out_aug = jax.lax.dot_general(v_ref[h], eb, (((1,), (1,)), ((), ())),
                                      preferred_element_type=jnp.float32)  # (dh+1, tq)
        inv_l = pl.reciprocal(out_aug[dim_head:dim_head + 1, :], approx=True)
        outs.append((out_aug[:dim_head, :] * inv_l).astype(jnp.bfloat16))

    # ---- fused to_out (1x1 conv with bias) on the resident q-block ----
    hid = jnp.concatenate(outs, axis=0)                           # (hidden, tq) bf16
    o = jnp.dot(wout_ref[...], hid, preferred_element_type=jnp.float32) + bout_ref[...]
    o_ref[...] = o.astype(o_ref.dtype)


def attention_forward(x, params, *, heads, dim_head, tq=128):
    B, dim, n = x.shape
    hidden = heads * dim_head
    scale = dim_head ** -0.5

    cos, sin, rot = _rotary_tables(n, dim_head)                   # (n, dh), (dh, dh)
    cosH = jnp.tile(cos.T, (heads, 1))                            # (hidden, n) f32
    sinH = jnp.tile(sin.T, (heads, 1))

    # Fold rotate_half + softmax scale into the projection weights host-side.
    w_q, w_k, w_v = jnp.split(params["w_qkv"], 3, axis=0)         # (hidden, dim) each

    def rot_fold(w):                                              # blockdiag(rot) @ w
        wh = w.reshape(heads, dim_head, dim)
        return jnp.einsum("de,hec->hdc", rot, wh).reshape(hidden, dim)

    w_aug = jnp.concatenate(
        [w_q * scale, rot_fold(w_q) * scale, w_k, rot_fold(w_k), w_v],
        axis=0).astype(jnp.bfloat16)                              # (5*hidden, dim)

    tq = tq if (n % tq == 0) else n                               # lane-dense q blocks
    nq = n // tq
    kernel = functools.partial(_attention_kernel, heads=heads,
                               dim_head=dim_head, tq=tq)

    return pl.pallas_call(
        kernel,
        out_shape=jax.ShapeDtypeStruct((B, dim, n), jnp.float32),
        grid_spec=pltpu.PrefetchScalarGridSpec(
            num_scalar_prefetch=0,
            grid=(B, nq),
            in_specs=[
                pl.BlockSpec((None, dim, n), lambda b, q: (b, 0, 0)),     # x (bf16)
                pl.BlockSpec((5 * hidden, dim), lambda b, q: (0, 0)),     # w_aug
                pl.BlockSpec((hidden, n), lambda b, q: (0, 0)),           # cosH
                pl.BlockSpec((hidden, n), lambda b, q: (0, 0)),           # sinH
                pl.BlockSpec((dim, hidden), lambda b, q: (0, 0)),         # w_out
                pl.BlockSpec((dim, 1), lambda b, q: (0, 0)),              # b_out
            ],
            out_specs=pl.BlockSpec((None, dim, tq), lambda b, q: (b, 0, q)),
            scratch_shapes=[
                pltpu.VMEM((heads, dim_head, n), jnp.bfloat16),           # rotated K
                pltpu.VMEM((heads, dim_head + 1, n), jnp.bfloat16),       # V + ones row
            ],
        ),
        compiler_params=pltpu.CompilerParams(
            dimension_semantics=("parallel", "arbitrary"),
            vmem_limit_bytes=64 * 1024 * 1024,
        ),
    )(x.astype(jnp.bfloat16), w_aug, cosH, sinH,
      params["w_out"].astype(jnp.bfloat16), params["b_out"].reshape(dim, 1))


def reference_forward(x, params, *, heads, dim_head):
    """Pure-JAX f32 re-implementation of the PyTorch forward for verification."""
    B, dim, n = x.shape
    hidden = heads * dim_head
    cos_f, sin_f, _ = _rotary_tables(n, dim_head)                 # (n, dh)

    qkv = jnp.einsum("oc,bcn->bon", params["w_qkv"], x)
    qc, kc, vc = jnp.split(qkv, 3, axis=1)
    to_heads = lambda t: t.reshape(B, heads, dim_head, n).transpose(0, 1, 3, 2)
    q, k, v = map(to_heads, (qc, kc, vc))                         # b h n d

    def rot_half(t):
        t2 = t.reshape(*t.shape[:-1], dim_head // 2, 2)
        return jnp.stack([-t2[..., 1], t2[..., 0]], axis=-1).reshape(t.shape)

    q = q * cos_f + rot_half(q) * sin_f
    k = k * cos_f + rot_half(k) * sin_f

    sim = jnp.einsum("bhid,bhjd->bhij", q, k) * dim_head ** -0.5
    attn = jax.nn.softmax(sim, axis=-1)
    out = jnp.einsum("bhij,bhjd->bhid", attn, v)
    out = out.transpose(0, 1, 3, 2).reshape(B, hidden, n)         # b (h d) n
    return (jnp.einsum("oc,bcn->bon", params["w_out"], out)
            + params["b_out"][None, :, None])


if __name__ == "__main__":
    B, DIM, N = 2, 32, 256           # N multiple of 128 -> lane-dense q blocks
    HEADS, DIM_HEAD = 4, 8
    HIDDEN = HEADS * DIM_HEAD

    key = jax.random.PRNGKey(0)
    k1, k2, k3, k4 = jax.random.split(key, 4)
    x = jax.random.normal(k1, (B, DIM, N), jnp.float32)
    params = {
        "w_qkv": 0.1 * jax.random.normal(k2, (3 * HIDDEN, DIM), jnp.float32),
        "w_out": 0.1 * jax.random.normal(k3, (DIM, HIDDEN), jnp.float32),
        "b_out": 0.1 * jax.random.normal(k4, (DIM,), jnp.float32),
    }

    out = attention_forward(x, params, heads=HEADS, dim_head=DIM_HEAD)
    out = jax.block_until_ready(out)

    ref = reference_forward(x, params, heads=HEADS, dim_head=DIM_HEAD)
    assert out.shape == (B, DIM, N), out.shape
    # bf16 MXU operands + approx reciprocal -> relaxed tolerance vs f32 reference.
    max_err = float(jnp.max(jnp.abs(out - ref)))
    assert jnp.allclose(out, ref, atol=5e-2, rtol=5e-2), max_err

    # TODO(synk): flash / cross-attention (use_xattn) branches and train-time
    # dropout are not exercised by this eval-mode self-attention forward;
    # full flash-style k-block online softmax is a further step for very large N.
    print("KERNEL_OK")
</pallas_src>

<mosaic_0001>
module attributes {stable_mosaic.version = 11 : i64} {
  func.func @_attention_kernel(%arg0: i32, %arg1: i32, %arg2: memref<1x32x256xbf16, #tpu.memory_space<vmem>>, %arg3: memref<160x32xbf16, #tpu.memory_space<vmem>>, %arg4: memref<32x256xf32, #tpu.memory_space<vmem>>, %arg5: memref<32x256xf32, #tpu.memory_space<vmem>>, %arg6: memref<32x32xbf16, #tpu.memory_space<vmem>>, %arg7: memref<32x1xf32, #tpu.memory_space<vmem>>, %arg8: memref<1x32x128xf32, #tpu.memory_space<vmem>>, %arg9: memref<4x8x256xbf16, #tpu.memory_space<vmem>>, %arg10: memref<4x9x256xbf16, #tpu.memory_space<vmem>>) attributes {dimension_semantics = [#tpu.dimension_semantics<parallel>, #tpu.dimension_semantics<arbitrary>], iteration_bounds = array<i64: 2, 2>, scalar_prefetch = 0 : i64, scratch_operands = 2 : i64, tpu.core_type = #tpu.core_type<tc>, window_params = [{transform_indices = @transform_0, window_bounds = array<i64: 1, 32, 256>}, {pipeline_mode = #tpu.pipeline_mode<synchronous>, transform_indices = @transform_1, window_bounds = array<i64: 160, 32>}, {pipeline_mode = #tpu.pipeline_mode<synchronous>, transform_indices = @transform_2, window_bounds = array<i64: 32, 256>}, {pipeline_mode = #tpu.pipeline_mode<synchronous>, transform_indices = @transform_3, window_bounds = array<i64: 32, 256>}, {pipeline_mode = #tpu.pipeline_mode<synchronous>, transform_indices = @transform_4, window_bounds = array<i64: 32, 32>}, {pipeline_mode = #tpu.pipeline_mode<synchronous>, transform_indices = @transform_5, window_bounds = array<i64: 32, 1>}, {transform_indices = @transform_6, window_bounds = array<i64: 1, 32, 128>}]} {
    %c0 = arith.constant 0 : index
    %c0_0 = arith.constant 0 : index
    %0 = vector.load %arg3[%c0, %c0_0] : memref<160x32xbf16, #tpu.memory_space<vmem>>, vector<160x32xbf16>
    %c0_i32 = arith.constant 0 : i32
    %1 = arith.cmpi eq, %arg1, %c0_i32 : i32
    %2 = arith.extui %1 : i1 to i32
    %c0_i32_1 = arith.constant 0 : i32
    %3 = arith.cmpi ne, %2, %c0_i32_1 : i32
    scf.if %3 {
      %c0_47 = arith.constant 0 : index
      %c0_48 = arith.constant 0 : index
      %c0_49 = arith.constant 0 : index
      %109 = vector.load %arg2[%c0_47, %c0_48, %c0_49] : memref<1x32x256xbf16, #tpu.memory_space<vmem>>, vector<1x32x256xbf16>
      %110 = vector.shape_cast %109 : vector<1x32x256xbf16> to vector<32x256xbf16>
      %111 = vector.extract_strided_slice %0 {offsets = [64, 0], sizes = [96, 32], strides = [1, 1]} : vector<160x32xbf16> to vector<96x32xbf16>
      %cst_50 = arith.constant dense<0.000000e+00> : vector<96x256xf32>
      %112 = tpu.matmul %111, %110, %cst_50 {dimension_numbers = #tpu.dot_dimension_numbers<[1], [0], [0], [1], [0, 0, 1, 1], [], []>} : vector<96x32xbf16>, vector<32x256xbf16>, vector<96x256xf32> -> vector<96x256xf32>
      %113 = vector.extract_strided_slice %112 {offsets = [0, 0], sizes = [32, 256], strides = [1, 1]} : vector<96x256xf32> to vector<32x256xf32>
      %c0_51 = arith.constant 0 : index
      %c0_52 = arith.constant 0 : index
      %114 = vector.load %arg4[%c0_51, %c0_52] : memref<32x256xf32, #tpu.memory_space<vmem>>, vector<32x256xf32>
      %115 = arith.mulf %113, %114 : vector<32x256xf32>
      %116 = vector.extract_strided_slice %112 {offsets = [32, 0], sizes = [32, 256], strides = [1, 1]} : vector<96x256xf32> to vector<32x256xf32>
      %c0_53 = arith.constant 0 : index
      %c0_54 = arith.constant 0 : index
      %117 = vector.load %arg5[%c0_53, %c0_54] : memref<32x256xf32, #tpu.memory_space<vmem>>, vector<32x256xf32>
      %118 = arith.mulf %116, %117 : vector<32x256xf32>
      %119 = arith.addf %115, %118 : vector<32x256xf32>
      %120 = vector.extract_strided_slice %112 {offsets = [64, 0], sizes = [32, 256], strides = [1, 1]} : vector<96x256xf32> to vector<32x256xf32>
      %cst_55 = arith.constant 1.000000e+00 : f32
      %121 = vector.broadcast %cst_55 : f32 to vector<1x256xf32>
      %122 = vector.extract_strided_slice %119 {offsets = [0, 0], sizes = [8, 256], strides = [1, 1]} : vector<32x256xf32> to vector<8x256xf32>
      %123 = arith.truncf %122 : vector<8x256xf32> to vector<8x256xbf16>
      %c0_56 = arith.constant 0 : index
      %c0_57 = arith.constant 0 : index
      %c0_58 = arith.constant 0 : index
      %124 = vector.load %arg9[%c0_56, %c0_57, %c0_58] : memref<4x8x256xbf16, #tpu.memory_space<vmem>>, vector<1x8x256xbf16>
      %125 = vector.shape_cast %124 : vector<1x8x256xbf16> to vector<8x256xbf16>
      %126 = vector.shape_cast %123 : vector<8x256xbf16> to vector<1x8x256xbf16>
      tpu.vector_store %arg9[%c0_56, %c0_57, %c0_58], %126 {strides = array<i32>} : memref<4x8x256xbf16, #tpu.memory_space<vmem>>, vector<1x8x256xbf16>,
      %127 = vector.extract_strided_slice %120 {offsets = [0, 0], sizes = [8, 256], strides = [1, 1]} : vector<32x256xf32> to vector<8x256xf32>
      %128 = tpu.concatenate %127, %121 in 0 : vector<8x256xf32>, vector<1x256xf32> -> vector<9x256xf32>
      %129 = arith.truncf %128 : vector<9x256xf32> to vector<9x256xbf16>
      %c0_59 = arith.constant 0 : index
      %c0_60 = arith.constant 0 : index
      %c0_61 = arith.constant 0 : index
      %130 = vector.load %arg10[%c0_59, %c0_60, %c0_61] : memref<4x9x256xbf16, #tpu.memory_space<vmem>>, vector<1x9x256xbf16>
      %131 = vector.shape_cast %130 : vector<1x9x256xbf16> to vector<9x256xbf16>
      %132 = vector.shape_cast %129 : vector<9x256xbf16> to vector<1x9x256xbf16>
      tpu.vector_store %arg10[%c0_59, %c0_60, %c0_61], %132 {strides = array<i32>} : memref<4x9x256xbf16, #tpu.memory_space<vmem>>, vector<1x9x256xbf16>,
      %133 = vector.extract_strided_slice %119 {offsets = [8, 0], sizes = [8, 256], strides = [1, 1]} : vector<32x256xf32> to vector<8x256xf32>
      %134 = arith.truncf %133 : vector<8x256xf32> to vector<8x256xbf16>
      %c1_62 = arith.constant 1 : index
      %c0_63 = arith.constant 0 : index
      %c0_64 = arith.constant 0 : index
      %135 = vector.load %arg9[%c1_62, %c0_63, %c0_64] : memref<4x8x256xbf16, #tpu.memory_space<vmem>>, vector<1x8x256xbf16>
      %136 = vector.shape_cast %135 : vector<1x8x256xbf16> to vector<8x256xbf16>
      %137 = vector.shape_cast %134 : vector<8x256xbf16> to vector<1x8x256xbf16>
      tpu.vector_store %arg9[%c1_62, %c0_63, %c0_64], %137 {strides = array<i32>} : memref<4x8x256xbf16, #tpu.memory_space<vmem>>, vector<1x8x256xbf16>,
      %138 = vector.extract_strided_slice %120 {offsets = [8, 0], sizes = [8, 256], strides = [1, 1]} : vector<32x256xf32> to vector<8x256xf32>
      %139 = tpu.concatenate %138, %121 in 0 : vector<8x256xf32>, vector<1x256xf32> -> vector<9x256xf32>
      %140 = arith.truncf %139 : vector<9x256xf32> to vector<9x256xbf16>
      %c1_65 = arith.constant 1 : index
      %c0_66 = arith.constant 0 : index
      %c0_67 = arith.constant 0 : index
      %141 = vector.load %arg10[%c1_65, %c0_66, %c0_67] : memref<4x9x256xbf16, #tpu.memory_space<vmem>>, vector<1x9x256xbf16>
      %142 = vector.shape_cast %141 : vector<1x9x256xbf16> to vector<9x256xbf16>
      %143 = vector.shape_cast %140 : vector<9x256xbf16> to vector<1x9x256xbf16>
      tpu.vector_store %arg10[%c1_65, %c0_66, %c0_67], %143 {strides = array<i32>} : memref<4x9x256xbf16, #tpu.memory_space<vmem>>, vector<1x9x256xbf16>,
      %144 = vector.extract_strided_slice %119 {offsets = [16, 0], sizes = [8, 256], strides = [1, 1]} : vector<32x256xf32> to vector<8x256xf32>
      %145 = arith.truncf %144 : vector<8x256xf32> to vector<8x256xbf16>
      %c2_68 = arith.constant 2 : index
      %c0_69 = arith.constant 0 : index
      %c0_70 = arith.constant 0 : index
      %146 = vector.load %arg9[%c2_68, %c0_69, %c0_70] : memref<4x8x256xbf16, #tpu.memory_space<vmem>>, vector<1x8x256xbf16>
      %147 = vector.shape_cast %146 : vector<1x8x256xbf16> to vector<8x256xbf16>
      %148 = vector.shape_cast %145 : vector<8x256xbf16> to vector<1x8x256xbf16>
      tpu.vector_store %arg9[%c2_68, %c0_69, %c0_70], %148 {strides = array<i32>} : memref<4x8x256xbf16, #tpu.memory_space<vmem>>, vector<1x8x256xbf16>,
      %149 = vector.extract_strided_slice %120 {offsets = [16, 0], sizes = [8, 256], strides = [1, 1]} : vector<32x256xf32> to vector<8x256xf32>
      %150 = tpu.concatenate %149, %121 in 0 : vector<8x256xf32>, vector<1x256xf32> -> vector<9x256xf32>
      %151 = arith.truncf %150 : vector<9x256xf32> to vector<9x256xbf16>
      %c2_71 = arith.constant 2 : index
      %c0_72 = arith.constant 0 : index
      %c0_73 = arith.constant 0 : index
      %152 = vector.load %arg10[%c2_71, %c0_72, %c0_73] : memref<4x9x256xbf16, #tpu.memory_space<vmem>>, vector<1x9x256xbf16>
      %153 = vector.shape_cast %152 : vector<1x9x256xbf16> to vector<9x256xbf16>
      %154 = vector.shape_cast %151 : vector<9x256xbf16> to vector<1x9x256xbf16>
      tpu.vector_store %arg10[%c2_71, %c0_72, %c0_73], %154 {strides = array<i32>} : memref<4x9x256xbf16, #tpu.memory_space<vmem>>, vector<1x9x256xbf16>,
      %155 = vector.extract_strided_slice %119 {offsets = [24, 0], sizes = [8, 256], strides = [1, 1]} : vector<32x256xf32> to vector<8x256xf32>
      %156 = arith.truncf %155 : vector<8x256xf32> to vector<8x256xbf16>
      %c3_74 = arith.constant 3 : index
      %c0_75 = arith.constant 0 : index
      %c0_76 = arith.constant 0 : index
      %157 = vector.load %arg9[%c3_74, %c0_75, %c0_76] : memref<4x8x256xbf16, #tpu.memory_space<vmem>>, vector<1x8x256xbf16>
      %158 = vector.shape_cast %157 : vector<1x8x256xbf16> to vector<8x256xbf16>
      %159 = vector.shape_cast %156 : vector<8x256xbf16> to vector<1x8x256xbf16>
      tpu.vector_store %arg9[%c3_74, %c0_75, %c0_76], %159 {strides = array<i32>} : memref<4x8x256xbf16, #tpu.memory_space<vmem>>, vector<1x8x256xbf16>,
      %160 = vector.extract_strided_slice %120 {offsets = [24, 0], sizes = [8, 256], strides = [1, 1]} : vector<32x256xf32> to vector<8x256xf32>
      %161 = tpu.concatenate %160, %121 in 0 : vector<8x256xf32>, vector<1x256xf32> -> vector<9x256xf32>
      %162 = arith.truncf %161 : vector<9x256xf32> to vector<9x256xbf16>
      %c3_77 = arith.constant 3 : index
      %c0_78 = arith.constant 0 : index
      %c0_79 = arith.constant 0 : index
      %163 = vector.load %arg10[%c3_77, %c0_78, %c0_79] : memref<4x9x256xbf16, #tpu.memory_space<vmem>>, vector<1x9x256xbf16>
      %164 = vector.shape_cast %163 : vector<1x9x256xbf16> to vector<9x256xbf16>
      %165 = vector.shape_cast %162 : vector<9x256xbf16> to vector<1x9x256xbf16>
      tpu.vector_store %arg10[%c3_77, %c0_78, %c0_79], %165 {strides = array<i32>} : memref<4x9x256xbf16, #tpu.memory_space<vmem>>, vector<1x9x256xbf16>,
    } else {
    }
    %c128_i32 = arith.constant 128 : i32
    %4 = arith.muli %arg1, %c128_i32 : i32
    %5 = tpu.assume_multiple %4, 128 : i32
    %c0_2 = arith.constant 0 : index
    %c0_3 = arith.constant 0 : index
    %6 = arith.index_cast %5 : i32 to index
    %7 = vector.load %arg2[%c0_2, %c0_3, %6] : memref<1x32x256xbf16, #tpu.memory_space<vmem>>, vector<1x32x128xbf16>
    %8 = vector.shape_cast %7 : vector<1x32x128xbf16> to vector<32x128xbf16>
    %9 = vector.extract_strided_slice %0 {offsets = [0, 0], sizes = [64, 32], strides = [1, 1]} : vector<160x32xbf16> to vector<64x32xbf16>
    %cst = arith.constant dense<0.000000e+00> : vector<64x128xf32>
    %10 = tpu.matmul %9, %8, %cst {dimension_numbers = #tpu.dot_dimension_numbers<[1], [0], [0], [1], [0, 0, 1, 1], [], []>} : vector<64x32xbf16>, vector<32x128xbf16>, vector<64x128xf32> -> vector<64x128xf32>
    %c0_4 = arith.constant 0 : index
    %11 = arith.index_cast %5 : i32 to index
    %12 = vector.load %arg4[%c0_4, %11] : memref<32x256xf32, #tpu.memory_space<vmem>>, vector<32x128xf32>
    %c0_5 = arith.constant 0 : index
    %13 = arith.index_cast %5 : i32 to index
    %14 = vector.load %arg5[%c0_5, %13] : memref<32x256xf32, #tpu.memory_space<vmem>>, vector<32x128xf32>
    %15 = vector.extract_strided_slice %10 {offsets = [0, 0], sizes = [32, 128], strides = [1, 1]} : vector<64x128xf32> to vector<32x128xf32>
    %16 = arith.mulf %15, %12 : vector<32x128xf32>
    %17 = vector.extract_strided_slice %10 {offsets = [32, 0], sizes = [32, 128], strides = [1, 1]} : vector<64x128xf32> to vector<32x128xf32>
    %18 = arith.mulf %17, %14 : vector<32x128xf32>
    %19 = arith.addf %16, %18 : vector<32x128xf32>
    %20 = vector.extract_strided_slice %19 {offsets = [0, 0], sizes = [8, 128], strides = [1, 1]} : vector<32x128xf32> to vector<8x128xf32>
    %21 = arith.truncf %20 : vector<8x128xf32> to vector<8x128xbf16>
    %c0_6 = arith.constant 0 : index
    %c0_7 = arith.constant 0 : index
    %c0_8 = arith.constant 0 : index
    %22 = vector.load %arg9[%c0_6, %c0_7, %c0_8] : memref<4x8x256xbf16, #tpu.memory_space<vmem>>, vector<1x8x256xbf16>
    %23 = vector.shape_cast %22 : vector<1x8x256xbf16> to vector<8x256xbf16>
    %cst_9 = arith.constant dense<0.000000e+00> : vector<128x256xf32>
    %24 = tpu.matmul %21, %23, %cst_9 {dimension_numbers = #tpu.dot_dimension_numbers<[0], [0], [1], [1], [0, 1, 1, 1], [], []>} : vector<8x128xbf16>, vector<8x256xbf16>, vector<128x256xf32> -> vector<128x256xf32>
    %cst_10 = arith.constant dense<0xFF800000> : vector<128xf32>
    %25 = vector.multi_reduction <maximumf>, %24, %cst_10 [1] : vector<128x256xf32> to vector<128xf32>
    %26 = vector.shape_cast %25 : vector<128xf32> to vector<128x1xf32>
    %27 = vector.broadcast %26 : vector<128x1xf32> to vector<128x256xf32>
    %28 = arith.subf %24, %27 : vector<128x256xf32>
    %29 = math.exp %28 : vector<128x256xf32>
    %30 = arith.truncf %29 : vector<128x256xf32> to vector<128x256xbf16>
    %c0_11 = arith.constant 0 : index
    %c0_12 = arith.constant 0 : index
    %c0_13 = arith.constant 0 : index
    %31 = vector.load %arg10[%c0_11, %c0_12, %c0_13] : memref<4x9x256xbf16, #tpu.memory_space<vmem>>, vector<1x9x256xbf16>
    %32 = vector.shape_cast %31 : vector<1x9x256xbf16> to vector<9x256xbf16>
    %cst_14 = arith.constant dense<0.000000e+00> : vector<9x128xf32>
    %33 = tpu.matmul %32, %30, %cst_14 {dimension_numbers = #tpu.dot_dimension_numbers<[1], [1], [0], [0], [0, 0, 1, 0], [], []>} : vector<9x256xbf16>, vector<128x256xbf16>, vector<9x128xf32> -> vector<9x128xf32>
    %34 = vector.extract_strided_slice %33 {offsets = [8, 0], sizes = [1, 128], strides = [1, 1]} : vector<9x128xf32> to vector<1x128xf32>
    %35 = tpu.reciprocal %34 {approx = true} : vector<1x128xf32> -> vector<1x128xf32>
    %36 = vector.extract_strided_slice %33 {offsets = [0, 0], sizes = [8, 128], strides = [1, 1]} : vector<9x128xf32> to vector<8x128xf32>
    %37 = vector.broadcast %35 : vector<1x128xf32> to vector<8x128xf32>
    %38 = arith.mulf %36, %37 : vector<8x128xf32>
    %39 = arith.truncf %38 : vector<8x128xf32> to vector<8x128xbf16>
    %40 = vector.extract_strided_slice %19 {offsets = [8, 0], sizes = [8, 128], strides = [1, 1]} : vector<32x128xf32> to vector<8x128xf32>
    %41 = arith.truncf %40 : vector<8x128xf32> to vector<8x128xbf16>
    %c1 = arith.constant 1 : index
    %c0_15 = arith.constant 0 : index
    %c0_16 = arith.constant 0 : index
    %42 = vector.load %arg9[%c1, %c0_15, %c0_16] : memref<4x8x256xbf16, #tpu.memory_space<vmem>>, vector<1x8x256xbf16>
    %43 = vector.shape_cast %42 : vector<1x8x256xbf16> to vector<8x256xbf16>
    %cst_17 = arith.constant dense<0.000000e+00> : vector<128x256xf32>
    %44 = tpu.matmul %41, %43, %cst_17 {dimension_numbers = #tpu.dot_dimension_numbers<[0], [0], [1], [1], [0, 1, 1, 1], [], []>} : vector<8x128xbf16>, vector<8x256xbf16>, vector<128x256xf32> -> vector<128x256xf32>
    %cst_18 = arith.constant dense<0xFF800000> : vector<128xf32>
    %45 = vector.multi_reduction <maximumf>, %44, %cst_18 [1] : vector<128x256xf32> to vector<128xf32>
    %46 = vector.shape_cast %45 : vector<128xf32> to vector<128x1xf32>
    %47 = vector.broadcast %46 : vector<128x1xf32> to vector<128x256xf32>
    %48 = arith.subf %44, %47 : vector<128x256xf32>
    %49 = math.exp %48 : vector<128x256xf32>
    %50 = arith.truncf %49 : vector<128x256xf32> to vector<128x256xbf16>
    %c1_19 = arith.constant 1 : index
    %c0_20 = arith.constant 0 : index
    %c0_21 = arith.constant 0 : index
    %51 = vector.load %arg10[%c1_19, %c0_20, %c0_21] : memref<4x9x256xbf16, #tpu.memory_space<vmem>>, vector<1x9x256xbf16>
    %52 = vector.shape_cast %51 : vector<1x9x256xbf16> to vector<9x256xbf16>
    %cst_22 = arith.constant dense<0.000000e+00> : vector<9x128xf32>
    %53 = tpu.matmul %52, %50, %cst_22 {dimension_numbers = #tpu.dot_dimension_numbers<[1], [1], [0], [0], [0, 0, 1, 0], [], []>} : vector<9x256xbf16>, vector<128x256xbf16>, vector<9x128xf32> -> vector<9x128xf32>
    %54 = vector.extract_strided_slice %53 {offsets = [8, 0], sizes = [1, 128], strides = [1, 1]} : vector<9x128xf32> to vector<1x128xf32>
    %55 = tpu.reciprocal %54 {approx = true} : vector<1x128xf32> -> vector<1x128xf32>
    %56 = vector.extract_strided_slice %53 {offsets = [0, 0], sizes = [8, 128], strides = [1, 1]} : vector<9x128xf32> to vector<8x128xf32>
    %57 = vector.broadcast %55 : vector<1x128xf32> to vector<8x128xf32>
    %58 = arith.mulf %56, %57 : vector<8x128xf32>
    %59 = arith.truncf %58 : vector<8x128xf32> to vector<8x128xbf16>
    %60 = vector.extract_strided_slice %19 {offsets = [16, 0], sizes = [8, 128], strides = [1, 1]} : vector<32x128xf32> to vector<8x128xf32>
    %61 = arith.truncf %60 : vector<8x128xf32> to vector<8x128xbf16>
    %c2 = arith.constant 2 : index
    %c0_23 = arith.constant 0 : index
    %c0_24 = arith.constant 0 : index
    %62 = vector.load %arg9[%c2, %c0_23, %c0_24] : memref<4x8x256xbf16, #tpu.memory_space<vmem>>, vector<1x8x256xbf16>
    %63 = vector.shape_cast %62 : vector<1x8x256xbf16> to vector<8x256xbf16>
    %cst_25 = arith.constant dense<0.000000e+00> : vector<128x256xf32>
    %64 = tpu.matmul %61, %63, %cst_25 {dimension_numbers = #tpu.dot_dimension_numbers<[0], [0], [1], [1], [0, 1, 1, 1], [], []>} : vector<8x128xbf16>, vector<8x256xbf16>, vector<128x256xf32> -> vector<128x256xf32>
    %cst_26 = arith.constant dense<0xFF800000> : vector<128xf32>
    %65 = vector.multi_reduction <maximumf>, %64, %cst_26 [1] : vector<128x256xf32> to vector<128xf32>
    %66 = vector.shape_cast %65 : vector<128xf32> to vector<128x1xf32>
    %67 = vector.broadcast %66 : vector<128x1xf32> to vector<128x256xf32>
    %68 = arith.subf %64, %67 : vector<128x256xf32>
    %69 = math.exp %68 : vector<128x256xf32>
    %70 = arith.truncf %69 : vector<128x256xf32> to vector<128x256xbf16>
    %c2_27 = arith.constant 2 : index
    %c0_28 = arith.constant 0 : index
    %c0_29 = arith.constant 0 : index
    %71 = vector.load %arg10[%c2_27, %c0_28, %c0_29] : memref<4x9x256xbf16, #tpu.memory_space<vmem>>, vector<1x9x256xbf16>
    %72 = vector.shape_cast %71 : vector<1x9x256xbf16> to vector<9x256xbf16>
    %cst_30 = arith.constant dense<0.000000e+00> : vector<9x128xf32>
    %73 = tpu.matmul %72, %70, %cst_30 {dimension_numbers = #tpu.dot_dimension_numbers<[1], [1], [0], [0], [0, 0, 1, 0], [], []>} : vector<9x256xbf16>, vector<128x256xbf16>, vector<9x128xf32> -> vector<9x128xf32>
    %74 = vector.extract_strided_slice %73 {offsets = [8, 0], sizes = [1, 128], strides = [1, 1]} : vector<9x128xf32> to vector<1x128xf32>
    %75 = tpu.reciprocal %74 {approx = true} : vector<1x128xf32> -> vector<1x128xf32>
    %76 = vector.extract_strided_slice %73 {offsets = [0, 0], sizes = [8, 128], strides = [1, 1]} : vector<9x128xf32> to vector<8x128xf32>
    %77 = vector.broadcast %75 : vector<1x128xf32> to vector<8x128xf32>
    %78 = arith.mulf %76, %77 : vector<8x128xf32>
    %79 = arith.truncf %78 : vector<8x128xf32> to vector<8x128xbf16>
    %80 = vector.extract_strided_slice %19 {offsets = [24, 0], sizes = [8, 128], strides = [1, 1]} : vector<32x128xf32> to vector<8x128xf32>
    %81 = arith.truncf %80 : vector<8x128xf32> to vector<8x128xbf16>
    %c3 = arith.constant 3 : index
    %c0_31 = arith.constant 0 : index
    %c0_32 = arith.constant 0 : index
    %82 = vector.load %arg9[%c3, %c0_31, %c0_32] : memref<4x8x256xbf16, #tpu.memory_space<vmem>>, vector<1x8x256xbf16>
    %83 = vector.shape_cast %82 : vector<1x8x256xbf16> to vector<8x256xbf16>
    %cst_33 = arith.constant dense<0.000000e+00> : vector<128x256xf32>
    %84 = tpu.matmul %81, %83, %cst_33 {dimension_numbers = #tpu.dot_dimension_numbers<[0], [0], [1], [1], [0, 1, 1, 1], [], []>} : vector<8x128xbf16>, vector<8x256xbf16>, vector<128x256xf32> -> vector<128x256xf32>
    %cst_34 = arith.constant dense<0xFF800000> : vector<128xf32>
    %85 = vector.multi_reduction <maximumf>, %84, %cst_34 [1] : vector<128x256xf32> to vector<128xf32>
    %86 = vector.shape_cast %85 : vector<128xf32> to vector<128x1xf32>
    %87 = vector.broadcast %86 : vector<128x1xf32> to vector<128x256xf32>
    %88 = arith.subf %84, %87 : vector<128x256xf32>
    %89 = math.exp %88 : vector<128x256xf32>
    %90 = arith.truncf %89 : vector<128x256xf32> to vector<128x256xbf16>
    %c3_35 = arith.constant 3 : index
    %c0_36 = arith.constant 0 : index
    %c0_37 = arith.constant 0 : index
    %91 = vector.load %arg10[%c3_35, %c0_36, %c0_37] : memref<4x9x256xbf16, #tpu.memory_space<vmem>>, vector<1x9x256xbf16>
    %92 = vector.shape_cast %91 : vector<1x9x256xbf16> to vector<9x256xbf16>
    %cst_38 = arith.constant dense<0.000000e+00> : vector<9x128xf32>
    %93 = tpu.matmul %92, %90, %cst_38 {dimension_numbers = #tpu.dot_dimension_numbers<[1], [1], [0], [0], [0, 0, 1, 0], [], []>} : vector<9x256xbf16>, vector<128x256xbf16>, vector<9x128xf32> -> vector<9x128xf32>
    %94 = vector.extract_strided_slice %93 {offsets = [8, 0], sizes = [1, 128], strides = [1, 1]} : vector<9x128xf32> to vector<1x128xf32>
    %95 = tpu.reciprocal %94 {approx = true} : vector<1x128xf32> -> vector<1x128xf32>
    %96 = vector.extract_strided_slice %93 {offsets = [0, 0], sizes = [8, 128], strides = [1, 1]} : vector<9x128xf32> to vector<8x128xf32>
    %97 = vector.broadcast %95 : vector<1x128xf32> to vector<8x128xf32>
    %98 = arith.mulf %96, %97 : vector<8x128xf32>
    %99 = arith.truncf %98 : vector<8x128xf32> to vector<8x128xbf16>
    %100 = tpu.concatenate %39, %59, %79, %99 in 0 : vector<8x128xbf16>, vector<8x128xbf16>, vector<8x128xbf16>, vector<8x128xbf16> -> vector<32x128xbf16>
    %c0_39 = arith.constant 0 : index
    %c0_40 = arith.constant 0 : index
    %101 = vector.load %arg6[%c0_39, %c0_40] : memref<32x32xbf16, #tpu.memory_space<vmem>>, vector<32x32xbf16>
    %cst_41 = arith.constant dense<0.000000e+00> : vector<32x128xf32>
    %102 = tpu.matmul %101, %100, %cst_41 {dimension_numbers = #tpu.dot_dimension_numbers<[1], [0], [0], [1], [0, 0, 1, 1], [], []>} : vector<32x32xbf16>, vector<32x128xbf16>, vector<32x128xf32> -> vector<32x128xf32>
    %c0_42 = arith.constant 0 : index
    %c0_43 = arith.constant 0 : index
    %103 = vector.load %arg7[%c0_42, %c0_43] : memref<32x1xf32, #tpu.memory_space<vmem>>, vector<32x1xf32>
    %104 = vector.broadcast %103 : vector<32x1xf32> to vector<32x128xf32>
    %105 = arith.addf %102, %104 : vector<32x128xf32>
    %c0_44 = arith.constant 0 : index
    %c0_45 = arith.constant 0 : index
    %c0_46 = arith.constant 0 : index
    %106 = vector.load %arg8[%c0_44, %c0_45, %c0_46] : memref<1x32x128xf32, #tpu.memory_space<vmem>>, vector<1x32x128xf32>
    %107 = vector.shape_cast %106 : vector<1x32x128xf32> to vector<32x128xf32>
    %108 = vector.shape_cast %105 : vector<32x128xf32> to vector<1x32x128xf32>
    tpu.vector_store %arg8[%c0_44, %c0_45, %c0_46], %108 {strides = array<i32>} : memref<1x32x128xf32, #tpu.memory_space<vmem>>, vector<1x32x128xf32>,
    return
  }
  func.func @transform_0(%arg0: i32, %arg1: i32) -> (i32, i32, i32) {
    %c0_i32 = arith.constant 0 : i32
    %c0_i32_0 = arith.constant 0 : i32
    %c0_i32_1 = arith.constant 0 : i32
    return %arg0, %c0_i32, %c0_i32_0 : i32, i32, i32
  }
  func.func @transform_1(%arg0: i32, %arg1: i32) -> (i32, i32) {
    %c0_i32 = arith.constant 0 : i32
    %c0_i32_0 = arith.constant 0 : i32
    %c0_i32_1 = arith.constant 0 : i32
    return %c0_i32, %c0_i32_0 : i32, i32
  }
  func.func @transform_2(%arg0: i32, %arg1: i32) -> (i32, i32) {
    %c0_i32 = arith.constant 0 : i32
    %c0_i32_0 = arith.constant 0 : i32
    %c0_i32_1 = arith.constant 0 : i32
    return %c0_i32, %c0_i32_0 : i32, i32
  }
  func.func @transform_3(%arg0: i32, %arg1: i32) -> (i32, i32) {
    %c0_i32 = arith.constant 0 : i32
    %c0_i32_0 = arith.constant 0 : i32
    %c0_i32_1 = arith.constant 0 : i32
    return %c0_i32, %c0_i32_0 : i32, i32
  }
  func.func @transform_4(%arg0: i32, %arg1: i32) -> (i32, i32) {
    %c0_i32 = arith.constant 0 : i32
    %c0_i32_0 = arith.constant 0 : i32
    %c0_i32_1 = arith.constant 0 : i32
    return %c0_i32, %c0_i32_0 : i32, i32
  }
  func.func @transform_5(%arg0: i32, %arg1: i32) -> (i32, i32) {
    %c0_i32 = arith.constant 0 : i32
    %c0_i32_0 = arith.constant 0 : i32
    %c0_i32_1 = arith.constant 0 : i32
    return %c0_i32, %c0_i32_0 : i32, i32
  }
  func.func @transform_6(%arg0: i32, %arg1: i32) -> (i32, i32, i32) {
    %c0_i32 = arith.constant 0 : i32
    %c0_i32_0 = arith.constant 0 : i32
    return %arg0, %c0_i32, %arg1 : i32, i32, i32
  }
}

</mosaic_0001>

<bundles_post_ra>
// kernel: tpu_custom_call.1
= control target key start
LH: loop header
LB: loop body
LE: loop exit
PB: predicated region body
PF: predicated region fallthrough
CT: control target
= control target key end

     0   :  { %s4221_s0 = inlined_call_operand.vmem [shape: bf16[2,32,256], index: 0, kind: input, shape index: {}]   ;;  %s4222_s1 = inlined_call_operand.vmem [shape: bf16[160,32], index: 1, kind: input, shape index: {}]   ;;  %s4223_s2 = inlined_call_operand.vmem [shape: f32[32,256], index: 2, kind: input, shape index: {}]   ;;  %s4224_s3 = inlined_call_operand.hbm [shape: f32[32,256], index: 3, kind: input, shape index: {}]   ;;  %s4225_s4 = inlined_call_operand.vmem [shape: bf16[32,32], index: 4, kind: input, shape index: {}]   ;;  %s4226_s5 = inlined_call_operand.vmem [shape: f32[32,1], index: 5, kind: input, shape index: {}]   ;;  %s4227_s6 = inlined_call_operand.hbm [shape: f32[2,32,256], index: 6, kind: output, shape index: {}]  }
   0x1   :  { %4275 = sst [smem:[#allocation32_spill]] %s4221_s0 }
   0x2   :  { %4276 = sst [smem:[#allocation33_spill]] %s4224_s3 }
   0x3   :  { %11 = vsyncpa [#allocation5], 0 }
   0x4   :  { %12 = vsyncpa [#allocation6], 0 }
   0x5   :  { %14 = vsyncpa [#allocation6 + $0x1], 0  ;;  %s3249_s21 = smov 0   ;;  %s3251_s22 = smov 0  }
   0x6   :  { %s3253_s23 = smov 0   ;;  %s3255_s24 = smov 0  }
   0x7   :  { %s3257_s25 = smov 0   ;;  %s3259_s26 = smov 0  }
   0x8   :  { %s3261_s27 = smov 0   ;;  %s3263_s28 = smov 0  }
   0x9 LB: > { %s2535_s29 = sadd.s32 4294967295, %s3203_s28   ;;  %s2536_s30 = sadd.s32 4294967294, %s3203_s28   ;;  %s3203_s28 = sphi %s3263_s28, %s20_s28   ;;  %s3199_s27 = sphi %s3261_s27, %s4379_s27   ;;  %s3195_s26 = sphi %s3259_s26, %s4378_s26   ;;  %s3191_s25 = sphi %s3257_s25, %s4377_s25   ;;  %s3187_s24 = sphi %s3255_s24, %s4376_s24   ;;  %s3183_s23 = sphi %s3253_s23, %s4375_s23   ;;  %s3179_s22 = sphi %s3251_s22, %s4374_s22   ;;  %s3175_s21 = sphi %s3249_s21, %s4373_s21  }
   0xa   : > { %s29_s7 = sadd.s32 1, %s3195_s26  ;;  %s32_s8 = sadd.s32 1, %s3199_s27 }
   0xb   : > { %p30_p0 = scmp.ge.s32.totalorder %s29_s7, 2  ;;  %s172_s9 = sadd.s32 1, %s3183_s23 }
   0xc   : > { %p182_p1 = scmp.ne.s32.totalorder %s3183_s23, %s3179_s22  ;;  %p183_p2 = scmp.eq.s32.totalorder %s2535_s29, 3 }
   0xd   : > { %s4381_s7 = smov (%p30_p0, %s29_s7), 0  ;;  %s4383_s8 = smov (!%p30_p0, %s32_s8), %s3199_s27 }
   0xe   : > { %s168_s10 = ssub.s32 %s3195_s26, %s4381_s7  ;;  %p3301_p3 = por %p183_p2, %p182_p1 }
   0xf   : > { %p34_p4 = scmp.ge.s32.totalorder %s4383_s8, 2  ;;  %p188_p5 = scmp.ne.s32.totalorder %s3179_s22, %s3175_s21 }
  0x10   : > { %p189_p6 = scmp.eq.s32.totalorder %s2536_s30, 3  ;;  %p2537_p7 = scmp.ge.s32.totalorder %s3203_s28, 1 }
  0x11   : > { %s4385_s8 = smov (%p34_p4, %s4383_s8), 0  ;;  %p196_p9 = scmp.lt.s32.totalorder %s3203_s28, 5 }
  0x12   : > { %4278 = sst [smem:[#allocation10_spill]] %s4385_s8  ;;  %p3310_p8 = por %p189_p6, %p188_p5 }
  0x13   : > { %s167_s13 = ssub.s32 %s3199_s27, %s4385_s8  ;;  %p3317_p10 = pnand %p2537_p7, %p196_p9 }
  0x14   : > { %s169_s14 = sor.u32 %s168_s10, %s167_s13  ;;  %p3321_p12 = scmp.eq.s32.totalorder %s2535_s29, 0 }
  0x15   : > { %p170_p11 = scmp.eq.s32.totalorder %s169_s14, 0  ;;  %p2702_p13 = pneg %p3317_p10 }
  0x16   : > { %s3205_s18 = smov [#allocation4]  }
  0x17   : > { %s3328_s17 = scalar_select %p170_p11, %s3183_s23, %s172_s9  }
  0x18   : > { %s214_s19 = sshll.u32 %s3205_s18, 4  ;;  %p3332_p0 = pnand %p3321_p12, %p2702_p13  ;;  %s215_s19 = int_to_ptr.vmem [resolvable:$true] %s214_s19 }
  0x19   : > { %s3092_s29 = scalar_lea.vmem %s215_s19, 1024  ;;  %p3100_p6 = scmp.lt.s32.totalorder %s215_s19, %s215_s19 }
  0x1a   : > { %p3083_p1 = pneg %p3332_p0  ;;  %p3093_p2 = scmp.ne.s32.totalorder %s215_s19, %s3092_s29 }
  0x1b   : > { %p3101_p7 = scmp.lt.s32.totalorder %s3092_s29, %s3092_s29 }
  0x1c   : > { %p3095_p4 = pnand %p3093_p2, %p3083_p1 }
  0x1d   : > { %p3102_p9 = por %p3101_p7, %p3100_p6 }
  0x1e   : > { %p3096_p5 = pneg %p3095_p4 }
  0x20   : > { %p3103_p11 = pnand %p3102_p9, %p3096_p5 }
  0x22   : > { %3106 = shalt.err (!%p3103_p11)
}
  0x23   : > { %s3206_s30 = smov 256   ;;  %s3207_s9 = smov 16  }
  0x24   : > { %s4283_s3 = sld [smem:[#allocation33_spill]] }
  0x26   : > { %244 = sbr.rel (%p3317_p10) target bundleno = 2085 (0x825), region = 44 }
  0x2a   : > { %2705 = dma.hbm_to_vmem [thread:$0]  (!%p3332_p0), %s4283_s3, 1024, %s215_s19, [#allocation5], %s3206_s30, %s3206_s30, %s3207_s9  }
  0x2b   : > { %3166 = dma.done.wait (%p3321_p12), [#allocation5], 1024  }
  0x2c   : > { %3168 = vsyncadd (%p3321_p12), [#allocation5], 4294966272  ;;  %s4229_s14 = sand.u32 1, %s3179_s22   ;;  %p274_p13 = scmp.lt.s32.totalorder %s3191_s25, 1  ;;  %v3362_v0 = vld [vmem:[%s4222_s1] sm:$0xf] }
  0x2d   : > { %s2542_s18 = sshll.u32 %s4229_s14, 5  ;;  %s4284_s0 = sld [smem:[#allocation32_spill]]  ;;  %v3367_v1 = vld [vmem:[%s4222_s1 + $0x4] sm:$0xf]  ;;  %v3372_v2 = vld [vmem:[%s4222_s1 + $0x8] sm:$0xf] }
  0x2e   : > { %s275_s20 = scalar_select %p274_p13, %s3191_s25, 1  ;;  %v3377_v3 = vld [vmem:[%s4222_s1 + $0xc] sm:$0xf]  ;;  %v3382_v4 = vld [vmem:[%s4222_s1 + $0x10] sm:$0xf] }
  0x2f   : > { %v3387_v5 = vld [vmem:[%s4222_s1 + $0x14] sm:$0xf]  ;;  %v3392_v6 = vld [vmem:[%s4222_s1 + $0x18] sm:$0xf]  ;;  %v3397_v7 = vld [vmem:[%s4222_s1 + $0x1c] sm:$0xf] }
  0x30   : > { %s2649_s29 = sshll.u32 %s275_s20, 5  ;;  %v288_v8 = vld [vmem:[%s4222_s1 + $0x20] sm:$0xf]  ;;  %v289_v9 = vld [vmem:[%s4222_s1 + $0x24] sm:$0xf]  ;;  %s3435_s14 = scalar_lea.vmem [#allocation7], %s2542_s18 }
  0x31   : > { %v290_v10 = vld [vmem:[%s4222_s1 + $0x28] sm:$0xf]  ;;  %v291_v11 = vld [vmem:[%s4222_s1 + $0x2c] sm:$0xf]  ;;  %v292_v12 = vld [vmem:[%s4222_s1 + $0x30] sm:$0xf] }
  0x32   : > { %v293_v13 = vld [vmem:[%s4222_s1 + $0x34] sm:$0xf]  ;;  %v294_v14 = vld [vmem:[%s4222_s1 + $0x38] sm:$0xf]  ;;  %v295_v15 = vld [vmem:[%s4222_s1 + $0x3c] sm:$0xf] }
  0x33   : > { %s3357_s15 = scalar_lea.vmem %s4284_s0, %s2649_s29  ;;  %v296_v16 = vld [vmem:[%s4222_s1 + $0x40] sm:$0xf]  ;;  %v297_v17 = vld [vmem:[%s4222_s1 + $0x44] sm:$0xf]  ;;  %v298_v18 = vld [vmem:[%s4222_s1 + $0x48] sm:$0xf] }
  0x34   : > { %v299_v19 = vld [vmem:[%s4222_s1 + $0x4c] sm:$0xf]  ;;  %p2545_p10 = scmp.ne.s32.totalorder %s3187_s24, 0 }
  0x36   : > { %303 = sbr.rel (%p2545_p10) target bundleno = 291 (0x123), region = 52 }
  0x3b   : > { %v2785_v20 = vld [vmem:[%s3357_s15 + $0x14] ss:$8 sps:$4 sm:$0xff]   ;;  %v2787_v21 = vld [vmem:[%s3357_s15 + $0x10] ss:$8 sps:$4 sm:$0xff]   ;;  %v3208_v22 = vmov 0   ;;  %v2546_v25 = vcombine.low %v288_v8, %v289_v9  ;;  %v2549_v26 = vcombine.low %v294_v14, %v295_v15  ;;  %vm358_vm0 = vcmask 261120  }
  0x3c   : > { %409 = vmatprep.mubr.bf16.mxu0 %v3208_v22  ;;  %439 = vmatprep.mubr.bf16.mxu1 %v3208_v22  ;;  %v2788_v23 = vld [vmem:[%s3357_s15 + $0x4] ss:$8 sps:$4 sm:$0xff]   ;;  %v2790_v24 = vld [vmem:[%s3357_s15] ss:$8 sps:$4 sm:$0xff]   ;;  %v2547_v27 = vcombine.low %v290_v10, %v291_v11  ;;  %v2550_v28 = vcombine.low %v296_v16, %v297_v17  ;;  %v2548_v29 = vcombine.low %v292_v12, %v293_v13  ;;  %vm532_vm1 = vcmask 1040384   ;;  %v476_v56 = vld [vmem:[%s4223_s2 + $0x30] sm:$0xff] }
  0x3d   : > { %389 = vmatprep.subr.bf16.mxu0 %v2785_v20  ;;  %2692 = vmatprep.subr.bf16.mxu1 %v2785_v20  ;;  %v2551_v30 = vcombine.low %v298_v18, %v299_v19  ;;  %vm533_vm2 = vsmask.f32 256  ;;  %vm535_vm3 = vcmask 1044484   ;;  %vm536_vm4 = vsmask.f32 4352  ;;  %v474_v47 = vld [vmem:[%s4223_s2 + $0x20] sm:$0xff] }
  0x3e   : > { %390 = vmatpush1.bf16.msra.mxu0 %v2787_v21  ;;  %2694 = vmatpush1.bf16.msra.mxu1 %v2787_v21  ;;  %vm534_vm5 = vmand %vm532_vm1, %vm533_vm2  ;;  %v539_v31 = vld [vmem:[#allocation3 + $0x38] sm:$0x11]  ;;  %v593_v33 = vld [vmem:[#allocation3 + $0x10] sm:$0x11] }
  0x3f   : > { %391 = vmatprep.subr.bf16.mxu0 %v2788_v23  ;;  %2693 = vmatprep.subr.bf16.mxu1 %v2788_v23  ;;  %vm537_vm6 = vmand %vm535_vm3, %vm536_vm4  ;;  %v566_v32 = vld [vmem:[#allocation3 + $0x18] sm:$0x11]  ;;  %v620_v34 = vld [vmem:[#allocation3 + $0x28] sm:$0x11] }
  0x40   : > { %vm538_vm7 = vmor %vm537_vm6, %vm534_vm5  ;;  %v490_v48 = vld [vmem:[#allocation4 + $0x20] sm:$0xff]  ;;  %v491_v49 = vld [vmem:[#allocation4 + $0x28] sm:$0xff] }
  0x41   : > { %v540_v35 = vsel %vm538_vm7, 1.0|1.0, %v539_v31  ;;  %v567_v36 = vsel %vm538_vm7, 1.0|1.0, %v566_v32  ;;  %v594_v37 = vsel %vm538_vm7, 1.0|1.0, %v593_v33 }
  0x42   : > { %392 = vmatpush1.bf16.msra.mxu0 %v2790_v24  ;;  %2695 = vmatpush1.bf16.msra.mxu1 %v2790_v24  ;;  %541 = vst [vmem:[#allocation3 + $0x38] sm:$0x11] %v540_v35  ;;  %568 = vst [vmem:[#allocation3 + $0x18] sm:$0x11] %v567_v36  ;;  %v621_v38 = vsel %vm538_vm7, 1.0|1.0, %v620_v34 }
  0x43   : > { %595 = vst [vmem:[#allocation3 + $0x10] sm:$0x11] %v594_v37  ;;  %622 = vst [vmem:[#allocation3 + $0x28] sm:$0x11] %v621_v38  ;;  %v475_v52 = vld [vmem:[%s4223_s2 + $0x28] sm:$0xff]  ;;  %v492_v59 = vld [vmem:[#allocation4 + $0x30] sm:$0xff] }
  0x44   : > { %v493_v62 = vld [vmem:[#allocation4 + $0x38] sm:$0xff]  ;;  %v486_v16 = vld [vmem:[#allocation4] sm:$0xff]  ;;  %v488_v32 = vld [vmem:[#allocation4 + $0x10] sm:$0xff] }
  0x45   : > { %2556 = vmatmul.mubr.msk.bf16.vlgmr.msra.gmra.mxu0 %vm358_vm0, %v2546_v25  ;;  %2559 = vmatmul.mubr.msk.bf16.vlgmr.msra.gmra.mxu1 %vm358_vm0, %v2549_v26  ;;  %v477_v9 = vld [vmem:[%s4223_s2 + $0x38] sm:$0xff]  ;;  %v470_v17 = vld [vmem:[%s4223_s2] sm:$0xff]  ;;  %v487_v25 = vld [vmem:[#allocation4 + $0x8] sm:$0xff] }
  0x46   : > { %419 = vmatprep.mubr.bf16.mxu0 %v3208_v22  ;;  %449 = vmatprep.mubr.bf16.mxu1 %v3208_v22  ;;  %v472_v34 = vld [vmem:[%s4223_s2 + $0x10] sm:$0xff]  ;;  %v473_v38 = vld [vmem:[%s4223_s2 + $0x18] sm:$0xff] }
  0x4d   : > { %2557 = vmatmul.mubr.msk.bf16.gmra.mxu0 %vm358_vm0, %v2547_v27  ;;  %2560 = vmatmul.mubr.msk.bf16.gmra.mxu1 %vm358_vm0, %v2550_v28 }
  0x4e   : > { %429 = vmatprep.mubr.bf16.mxu0 %v3208_v22  ;;  %459 = vmatprep.mubr.bf16.mxu1 %v3208_v22  ;;  %v471_v22 = vld [vmem:[%s4223_s2 + $0x8] sm:$0xff] }
  0x55   : > { %2558 = vmatmul.mubr.msk.bf16.gmra.mxu0 %vm358_vm0, %v2548_v29  ;;  %2561 = vmatmul.mubr.msk.bf16.gmra.mxu1 %vm358_vm0, %v2551_v30 }
 0x105   : > { %v411_v39 = vpop.f32.mrf.mxu0  ;;  %v441_v40 = vpop.f32.mrf.mxu1 }
 0x106   : > { %v498_v57 = vmul.f32 %v490_v48, %v441_v40  ;;  %v478_v29 = vmul.f32 %v470_v17, %v411_v39 }
 0x107   : > { %v413_v41 = vpop.f32.mrf.mxu0  ;;  %v443_v42 = vpop.f32.mrf.mxu1 }
 0x108   : > { %v499_v58 = vmul.f32 %v491_v49, %v443_v42  ;;  %v479_v33 = vmul.f32 %v471_v22, %v413_v41 }
 0x109   : > { %v3442_v43 = vpop.f32.mrf.mxu0  ;;  %v445_v44 = vpop.f32.mrf.mxu1 }
 0x10a   : > { %v500_v13 = vmul.f32 %v492_v59, %v445_v44  ;;  %v489_v44 = vld [vmem:[#allocation4 + $0x18] sm:$0xff]  ;;  %v480_v41 = vmul.f32 %v472_v34, %v3442_v43 }
 0x10b   : > { %v3444_v45 = vpop.f32.mrf.mxu0  ;;  %v447_v46 = vpop.f32.mrf.mxu1 }
 0x10c   : > { %v501_v18 = vmul.f32 %v493_v62, %v447_v46 }
 0x10d   : > { %v421_v50 = vpop.f32.mrf.mxu0  ;;  %v451_v51 = vpop.f32.mrf.mxu1 }
 0x10e   : > { %v482_v53 = vmul.f32 %v474_v47, %v421_v50  ;;  %v481_v50 = vmul.f32 %v473_v38, %v3444_v45 }
 0x10f   : > { %v423_v54 = vpop.f32.mrf.mxu0  ;;  %v453_v55 = vpop.f32.mrf.mxu1 }
 0x110   : > { %v483_v60 = vmul.f32 %v475_v52, %v423_v54  ;;  %v2651_v61 = vpack.c.bf16 %v453_v55, %v451_v51  ;;  %v506_v10 = vadd.f32 %v498_v57, %v482_v53 }
 0x111   : > { %v425_v63 = vpop.f32.mrf.mxu0  ;;  %v455_v8 = vpop.f32.mrf.mxu1 }
 0x112   : > { %v507_v11 = vadd.f32 %v499_v58, %v483_v60  ;;  %531 = vst [vmem:[#allocation3] sm:$0xff] %v2651_v61  ;;  %v484_v12 = vmul.f32 %v476_v56, %v425_v63 }
 0x113   : > { %v427_v14 = vpop.f32.mrf.mxu0  ;;  %v457_v15 = vpop.f32.mrf.mxu1 }
 0x114   : > { %v2656_v19 = vpack.c.bf16 %v507_v11, %v506_v10  ;;  %v485_v20 = vmul.f32 %v477_v9, %v427_v14  ;;  %v2654_v21 = vpack.c.bf16 %v457_v15, %v455_v8  ;;  %v508_v26 = vadd.f32 %v500_v13, %v484_v12 }
 0x115   : > { %v431_v23 = vpop.f32.mrf.mxu0  ;;  %v461_v24 = vpop.f32.mrf.mxu1 }
 0x116   : > { %578 = vst [vmem:[#allocation2 + $0x18] sm:$0xff] %v2656_v19  ;;  %v509_v27 = vadd.f32 %v501_v18, %v485_v20  ;;  %565 = vst [vmem:[#allocation3 + $0x8] sm:$0xff] %v2654_v21  ;;  %v494_v28 = vmul.f32 %v486_v16, %v431_v23 }
 0x117   : > { %v433_v30 = vpop.f32.mrf.mxu0  ;;  %v463_v31 = vpop.f32.mrf.mxu1 }
 0x118   : > { %v2659_v35 = vpack.c.bf16 %v509_v27, %v508_v26  ;;  %v495_v36 = vmul.f32 %v487_v25, %v433_v30  ;;  %v2657_v37 = vpack.c.bf16 %v463_v31, %v461_v24  ;;  %v502_v39 = vadd.f32 %v494_v28, %v478_v29 }
 0x119   : > { %v435_v40 = vpop.f32.mrf.mxu0  ;;  %v465_v42 = vpop.f32.mrf.mxu1 }
 0x11a   : > { %605 = vst [vmem:[#allocation2 + $0x8] sm:$0xff] %v2659_v35  ;;  %v503_v46 = vadd.f32 %v495_v36, %v479_v33  ;;  %592 = vst [vmem:[#allocation3 + $0x20] sm:$0xff] %v2657_v37  ;;  %v496_v47 = vmul.f32 %v488_v32, %v435_v40 }
 0x11b   : > { %v437_v48 = vpop.f32.mrf.mxu0  ;;  %v467_v49 = vpop.f32.mrf.mxu1 }
 0x11c   : > { %v2650_v51 = vpack.c.bf16 %v503_v46, %v502_v39  ;;  %v497_v52 = vmul.f32 %v489_v44, %v437_v48  ;;  %v2660_v53 = vpack.c.bf16 %v467_v49, %v465_v42  ;;  %v504_v54 = vadd.f32 %v496_v47, %v480_v41 }
 0x11e   : > { %518 = vst [vmem:[#allocation2 + $0x10] sm:$0xff] %v2650_v51  ;;  %v505_v55 = vadd.f32 %v497_v52, %v481_v50  ;;  %619 = vst [vmem:[#allocation3 + $0x30] sm:$0xff] %v2660_v53 }
 0x120   : > { %v2653_v56 = vpack.c.bf16 %v505_v55, %v504_v54 }
 0x122   : > { %551 = vst [vmem:[#allocation2] sm:$0xff] %v2653_v56 }
 0x123 PF: > { %s2574_s19 = sshll.u32 %s3187_s24, 7  ;;  %v2576_v43 = vcombine.low %v3362_v0, %v3367_v1  ;;  %vm664_vm8 = vcmask 261120   ;;  %v2577_v58 = vcombine.low %v3372_v2, %v3377_v3  ;;  %v2578_v0 = vcombine.low %v3382_v4, %v3387_v5  ;;  %s2442_s20 = sshll.u32 %s3435_s14, 4  ;;  %s4164_s20 = int_to_ptr.vmem [resolvable:$true] %s2442_s20 }
 0x124   : > { %s3475_s30 = sshra.s32 %s2574_s19, 7  ;;  %v2579_v1 = vcombine.low %v3392_v6, %v3397_v7  ;;  %vm814_vm9 = vcmask 1043456   ;;  %v4230_v62 = vmov 0   ;;  %vm789_vm10 = vcmask 64512   ;;  %s4371_s19 = sand.u32 1, %s3179_s22  }
 0x125   : > { %s2575_s9 = sshll.u32 %s3475_s30, 2  ;;  %2676 = vmatprep.mubr.msk.bf16.mxu0 %vm664_vm8, %v2576_v43  ;;  %853 = vmatprep.mubr.bf16.mxu1 %v4230_v62  ;;  %v767_v25 = vld [vmem:[#allocation2 + $0x10] sm:$0xff] }
 0x126   : > { %s627_s10 = scalar_lea.vmem %s3357_s15, %s2575_s9  ;;  %s2586_s15 = sshll.u32 %s3475_s30, 3  ;;  %v2589_v26 = vcombine.high %v767_v25, %v767_v25  ;;  %v2588_v27 = vcombine.low %v767_v25, %v767_v25 }
 0x127   : > { %v2793_v45 = vld [vmem:[%s627_s10 + $0x10] ss:$8 sps:$4 sm:$0xff]   ;;  %v2794_v57 = vld [vmem:[%s627_s10] ss:$8 sps:$4 sm:$0xff]   ;;  %s3497_s0 = scalar_lea.vmem %s4223_s2, %s2586_s15  ;;  %s749_s8 = scalar_lea.vmem [#allocation4], %s2586_s15 }
 0x128   : > { %2672 = vmatprep.subr.bf16.mxu0 %v2793_v45  ;;  %v746_v3 = vld [vmem:[%s3497_s0 + $0x20] sm:$0xff]  ;;  %v747_v7 = vld [vmem:[%s3497_s0 + $0x30] sm:$0xff]  ;;  %2590 = vmatprep.subr.msk.bf16.mxu1 %vm814_vm9, %v2589_v26  ;;  %v816_v29 = vsel %vm814_vm9, %v2588_v27, 0  ;;  %s4170_s30 = scalar_lea.sflag [#allocation6], %s4371_s19  ;;  %s3107_s9 = scalar_lea.vmem %s4164_s20, 512 }
 0x129   : > { %2673 = vmatpush3.bf16.msra.mxu0 %v2793_v45  ;;  %v1156_v59 = vld [vmem:[#allocation2] sm:$0xff]  ;;  %v753_v14 = vld [vmem:[%s749_s8 + $0x30] sm:$0xff]  ;;  %836 = vmatpush1.bf16.msra.mxu1 %v816_v29  ;;  %p3108_p12 = scmp.ne.s32.totalorder %s4164_s20, %s3107_s9  ;;  %s3210_s10 = smov [#allocation7]  }
 0x12a   : > { %2674 = vmatprep.subr.bf16.mxu0 %v2794_v57  ;;  %v2602_v60 = vcombine.high %v1156_v59, %v1156_v59  ;;  %v2601_v61 = vcombine.low %v1156_v59, %v1156_v59  ;;  %v752_v10 = vld [vmem:[%s749_s8 + $0x20] sm:$0xff]  ;;  %v745_v16 = vld [vmem:[%s3497_s0 + $0x10] sm:$0xff]  ;;  %s3111_s15 = sshll.u32 %s3210_s10, 4  ;;  %s3112_s15 = int_to_ptr.vmem [resolvable:$false] %s3111_s15 }
 0x12b   : > { %v751_v18 = vld [vmem:[%s749_s8 + $0x10] sm:$0xff]  ;;  %v750_v30 = vld [vmem:[%s749_s8] sm:$0xff]  ;;  %s2645_s8 = sshll.u32 %s3191_s25, 3  ;;  %p3109_p0 = pnand %p3108_p12, %p3301_p3 }
 0x12c   : > { %v1203_v2 = vsel %vm814_vm9, %v2601_v61, 0  ;;  %v744_v31 = vld [vmem:[%s3497_s0] sm:$0xff]  ;;  %s2439_s18 = sadd.s32 %s3187_s24, %s2645_s8  ;;  %s3113_s16 = scalar_lea.vmem %s3112_s15, 1024 }
 0x12d   : > { %2675 = vmatpush3.bf16.msra.mxu0 %v2794_v57  ;;  %s2646_s13 = sshll.u32 %s2439_s18, 7  ;;  %p3110_p1 = pneg %p3109_p0 }
 0x12e   : > { %2603 = vmatprep.subr.msk.bf16.mxu0 %vm814_vm9, %v2602_v60  ;;  %s4162_s24 = scalar_lea.hbm %s4227_s6, %s2646_s13  ;;  %p3114_p2 = scmp.lt.s32.totalorder %s4164_s20, %s3112_s15 }
 0x12f   : > { %p3115_p4 = scmp.lt.s32.totalorder %s3113_s16, %s3107_s9 }
 0x130   : > { %2677 = vmatmul.mubr.msk.bf16.vlgmr.msra.gmra.mxu0 %vm664_vm8, %v2577_v58 }
 0x131   : > { %2680 = vmatprep.mubr.msk.bf16.mxu0 %vm664_vm8, %v2578_v0  ;;  %1223 = vmatpush1.bf16.msra.mxu0 %v1203_v2  ;;  %p3116_p5 = por %p3115_p4, %p3114_p2 }
 0x133   : > { %p3117_p6 = pnand %p3116_p5, %p3110_p1 }
 0x138   : > { %2681 = vmatmul.mubr.msk.bf16.gmra.mxu0 %vm664_vm8, %v2579_v1 }
 0x139   : > { %1240 = vmatprep.mubr.bf16.mxu0 %v4230_v62 }
 0x1f0   : > { %v2678_v4 = vpop.f32.mrf.mxu0 }
 0x1f1   : > { %v756_v5 = vmul.f32 %v2678_v4, %v746_v3 }
 0x1f2   : > { %v711_v6 = vpop.f32.mrf.mxu0 }
 0x1f3   : > { %v754_v33 = vmul.f32 %v744_v31, %v711_v6 }
 0x1f4   : > { %v2679_v63 = vpop.f32.mrf.mxu0 }
 0x1f5   : > { %v757_v8 = vmul.f32 %v2679_v63, %v747_v7 }
 0x1f6   : > { %v714_v9 = vpop.f32.mrf.mxu0 }
 0x1f7   : > { %v755_v21 = vmul.f32 %v745_v16, %v714_v9 }
 0x1f8   : > { %v2682_v11 = vpop.f32.mrf.mxu0 }
 0x1f9   : > { %v760_v12 = vmul.f32 %v2682_v11, %v752_v10 }
 0x1fa   : > { %v727_v13 = vpop.f32.mrf.mxu0 }
 0x1fb   : > { %v3501_v15 = vadd.f32 %v760_v12, %v756_v5  ;;  %v758_v32 = vmul.f32 %v750_v30, %v727_v13 }
 0x1fc   : > { %v2683_v17 = vpop.f32.mrf.mxu0 }
 0x1fd   : > { %v761_v19 = vmul.f32 %v2683_v17, %v753_v14  ;;  %v762_v34 = vadd.f32 %v758_v32, %v754_v33 }
 0x1fe   : > { %v730_v20 = vpop.f32.mrf.mxu0 }
 0x1ff   : > { %v3504_v22 = vadd.f32 %v761_v19, %v757_v8  ;;  %v759_v23 = vmul.f32 %v751_v18, %v730_v20  ;;  %v766_v35 = vpack.c.bf16 %v762_v34, %v762_v34 }
 0x201   : > { %v763_v24 = vadd.f32 %v759_v23, %v755_v21 }
 0x203   : > { %v1154_v28 = vpack.c.bf16 %v763_v24, %v763_v24 }
 0x205   : > { %1157 = vxpose.xlu0.c.b16.start.end [1/1] (short) %v1154_v28, 128 }
 0x222   : > { %768 = vxpose.xlu0.c.b16.start.end [1/1] (short) %v766_v35, 128 }
 0x267   : > { %v1165_v36 = vpop.trf.xlu0 }
 0x268   : > { %2604 = vmatmul.mubr.msk.bf16.vlgmr.msra.gmra.mxu0 %vm789_vm10, %v1165_v36 }
 0x269   : > { %1250 = vmatprep.mubr.bf16.mxu0 %v4230_v62 }
 0x26b   : > { %v1166_v37 = vpop.trf.xlu0 }
 0x26f   : > { %v1167_v38 = vpop.trf.xlu0 }
 0x270   : > { %2605 = vmatmul.mubr.msk.bf16.gmra.mxu0 %vm789_vm10, %v1166_v37 }
 0x271   : > { %1260 = vmatprep.mubr.bf16.mxu0 %v4230_v62 }
 0x273   : > { %v1168_v40 = vpop.trf.xlu0 }
 0x277   : > { %v1169_v42 = vpop.trf.xlu0 }
 0x278   : > { %2606 = vmatmul.mubr.msk.bf16.gmra.mxu0 %vm789_vm10, %v1167_v38 }
 0x279   : > { %1270 = vmatprep.mubr.bf16.mxu0 %v4230_v62 }
 0x27b   : > { %v1170_v44 = vpop.trf.xlu0 }
 0x27f   : > { %v1171_v39 = vpop.trf.xlu0 }
 0x280   : > { %2607 = vmatmul.mubr.msk.bf16.gmra.mxu0 %vm789_vm10, %v1168_v40 }
 0x281   : > { %1280 = vmatprep.mubr.bf16.mxu0 %v4230_v62 }
 0x283   : > { %v1172_v46 = vpop.trf.xlu0 }
 0x287   : > { %v776_v47 = vpop.trf.xlu0 }
 0x288   : > { %2591 = vmatmul.mubr.msk.bf16.vlgmr.msra.gmra.mxu1 %vm789_vm10, %v776_v47  ;;  %2608 = vmatmul.mubr.msk.bf16.gmra.mxu0 %vm789_vm10, %v1169_v42 }
 0x289   : > { %863 = vmatprep.mubr.bf16.mxu1 %v4230_v62  ;;  %1290 = vmatprep.mubr.bf16.mxu0 %v4230_v62 }
 0x28b   : > { %v777_v41 = vpop.trf.xlu0 }
 0x28f   : > { %v778_v48 = vpop.trf.xlu0 }
 0x290   : > { %2592 = vmatmul.mubr.msk.bf16.gmra.mxu1 %vm789_vm10, %v777_v41  ;;  %2609 = vmatmul.mubr.msk.bf16.gmra.mxu0 %vm789_vm10, %v1170_v44 }
 0x291   : > { %873 = vmatprep.mubr.bf16.mxu1 %v4230_v62  ;;  %1300 = vmatprep.mubr.bf16.mxu0 %v4230_v62 }
 0x293   : > { %v779_v49 = vpop.trf.xlu0 }
 0x297   : > { %v780_v50 = vpop.trf.xlu0 }
 0x298   : > { %2593 = vmatmul.mubr.msk.bf16.gmra.mxu1 %vm789_vm10, %v778_v48  ;;  %2610 = vmatmul.mubr.msk.bf16.gmra.mxu0 %vm789_vm10, %v1171_v39 }
 0x299   : > { %883 = vmatprep.mubr.bf16.mxu1 %v4230_v62  ;;  %1310 = vmatprep.mubr.bf16.mxu0 %v4230_v62 }
 0x29b   : > { %v781_v51 = vpop.trf.xlu0 }
 0x29f   : > { %v782_v52 = vpop.trf.xlu0 }
 0x2a0   : > { %2594 = vmatmul.mubr.msk.bf16.gmra.mxu1 %vm789_vm10, %v779_v49  ;;  %2611 = vmatmul.mubr.msk.bf16.gmra.mxu0 %vm789_vm10, %v1172_v46 }
 0x2a1   : > { %893 = vmatprep.mubr.bf16.mxu1 %v4230_v62 }
 0x2a3   : > { %v783_v53 = vpop.trf.xlu0 }
 0x2a8   : > { %2595 = vmatmul.mubr.msk.bf16.gmra.mxu1 %vm789_vm10, %v780_v50 }
 0x2a9   : > { %903 = vmatprep.mubr.bf16.mxu1 %v4230_v62 }
 0x2b0   : > { %2596 = vmatmul.mubr.msk.bf16.gmra.mxu1 %vm789_vm10, %v781_v51 }
 0x2b1   : > { %913 = vmatprep.mubr.bf16.mxu1 %v4230_v62 }
 0x2b8   : > { %2597 = vmatmul.mubr.msk.bf16.gmra.mxu1 %vm789_vm10, %v782_v52 }
 0x2b9   : > { %923 = vmatprep.mubr.bf16.mxu1 %v4230_v62 }
 0x2c0   : > { %2598 = vmatmul.mubr.msk.bf16.gmra.mxu1 %vm789_vm10, %v783_v53 }
 0x328   : > { %v3539_v54 = vpop.f32.mrf.mxu0 }
 0x329   : > { %4285 = vst [vmem:[#allocation11_spill] sm:$0xff] %v3539_v54 }
 0x32a   : > { %v3541_v55 = vpop.f32.mrf.mxu0 }
 0x32b   : > { %4286 = vst [vmem:[#allocation12_spill] sm:$0xff] %v3541_v55  ;;  %v1321_v40 = vmax.f32 %v3539_v54, %v3541_v55 }
 0x32c   : > { %v3543_v56 = vpop.f32.mrf.mxu0 }
 0x32d   : > { %4287 = vst [vmem:[#allocation13_spill] sm:$0xff] %v3543_v56 }
 0x32e   : > { %v3545_v43 = vpop.f32.mrf.mxu0 }
 0x32f   : > { %4288 = vst [vmem:[#allocation14_spill] sm:$0xff] %v3545_v43 }
 0x330   : > { %v3547_v45 = vpop.f32.mrf.mxu0 }
 0x331   : > { %4289 = vst [vmem:[#allocation15_spill] sm:$0xff] %v3547_v45 }
 0x332   : > { %v3549_v57 = vpop.f32.mrf.mxu0 }
 0x333   : > { %4290 = vst [vmem:[#allocation16_spill] sm:$0xff] %v3549_v57  ;;  %v1327_v33 = vmax.f32 %v3547_v45, %v3549_v57 }
 0x334   : > { %v3551_v58 = vpop.f32.mrf.mxu0 }
 0x335   : > { %4291 = vst [vmem:[#allocation17_spill] sm:$0xff] %v3551_v58 }
 0x336   : > { %v3553_v0 = vpop.f32.mrf.mxu0 }
 0x337   : > { %4292 = vst [vmem:[#allocation18_spill] sm:$0xff] %v3553_v0 }
 0x338   : > { %v3555_v1 = vpop.f32.mrf.mxu0 }
 0x33a   : > { %v3557_v59 = vpop.f32.mrf.mxu0 }
 0x33b   : > { %v1333_v27 = vmax.f32 %v3555_v1, %v3557_v59 }
 0x33c   : > { %v3559_v60 = vpop.f32.mrf.mxu0 }
 0x33e   : > { %v3561_v61 = vpop.f32.mrf.mxu0 }
 0x33f   : > { %4293 = vst [vmem:[#allocation19_spill] sm:$0xff] %v3561_v61 }
 0x340   : > { %v3563_v2 = vpop.f32.mrf.mxu0 }
 0x342   : > { %v3565_v3 = vpop.f32.mrf.mxu0 }
 0x344   : > { %v3567_v4 = vpop.f32.mrf.mxu0 }
 0x346   : > { %v3569_v5 = vpop.f32.mrf.mxu0 }
 0x348   : > { %v3571_v6 = vpop.f32.mrf.mxu1  ;;  %v3573_v7 = vpop.f32.mrf.mxu0 }
 0x349   : > { %4294 = vst [vmem:[#allocation20_spill] sm:$0xff] %v3571_v6 }
 0x34a   : > { %v3575_v63 = vpop.f32.mrf.mxu1  ;;  %v3577_v8 = vpop.f32.mrf.mxu0 }
 0x34b   : > { %4295 = vst [vmem:[#allocation21_spill] sm:$0xff] %v3575_v63  ;;  %v934_v39 = vmax.f32 %v3571_v6, %v3575_v63 }
 0x34c   : > { %v3579_v9 = vpop.f32.mrf.mxu1  ;;  %v3581_v10 = vpop.f32.mrf.mxu0 }
 0x34d   : > { %4296 = vst [vmem:[#allocation22_spill] sm:$0xff] %v3579_v9 }
 0x34e   : > { %v3583_v11 = vpop.f32.mrf.mxu1  ;;  %v3585_v12 = vpop.f32.mrf.mxu0 }
 0x34f   : > { %4297 = vst [vmem:[#allocation23_spill] sm:$0xff] %v3583_v11  ;;  %v1348_v45 = vmax.f32 %v3581_v10, %v3585_v12 }
 0x350   : > { %v3587_v13 = vpop.f32.mrf.mxu1  ;;  %v3589_v14 = vpop.f32.mrf.mxu0 }
 0x351   : > { %4298 = vst [vmem:[#allocation24_spill] sm:$0xff] %v3587_v13 }
 0x352   : > { %v3591_v16 = vpop.f32.mrf.mxu1  ;;  %v3593_v17 = vpop.f32.mrf.mxu0 }
 0x353   : > { %4299 = vst [vmem:[#allocation25_spill] sm:$0xff] %v3591_v16  ;;  %v1351_v18 = vmax.f32 %v3589_v14, %v3593_v17  ;;  %v940_v36 = vmax.f32 %v3587_v13, %v3591_v16 }
 0x354   : > { %v3597_v19 = vpop.f32.mrf.mxu1  ;;  %v3599_v20 = vpop.f32.mrf.mxu0 }
 0x355   : > { %4300 = vst [vmem:[#allocation26_spill] sm:$0xff] %v3597_v19  ;;  %1352 = vmax.xlane.f32.xlu1 %v1351_v18 }
 0x356   : > { %v3601_v21 = vpop.f32.mrf.mxu1  ;;  %v3603_v23 = vpop.f32.mrf.mxu0 }
 0x357   : > { %4301 = vst [vmem:[#allocation27_spill] sm:$0xff] %v3601_v21  ;;  %v1354_v24 = vmax.f32 %v3599_v20, %v3603_v23 }
 0x358   : > { %v3607_v25 = vpop.f32.mrf.mxu1  ;;  %v3657_v52 = vpop.f32.mrf.mxu0 }
 0x359   : > { %1355 = vmax.xlane.f32.xlu0 %v1354_v24 }
 0x35a   : > { %v3609_v26 = vpop.f32.mrf.mxu1  ;;  %v3661_v18 = vpop.f32.mrf.mxu0 }
 0x35b   : > { %4302 = vst [vmem:[#allocation28_spill] sm:$0xff] %v3609_v26  ;;  %v946_v30 = vmax.f32 %v3607_v25, %v3609_v26 }
 0x35c   : > { %v3613_v28 = vpop.f32.mrf.mxu1 }
 0x35d   : > { %4303 = vst [vmem:[#allocation29_spill] sm:$0xff] %v3613_v28  ;;  %1334 = vmax.xlane.f32.xlu0 %v1333_v27  ;;  %v1357_v27 = vmax.f32 %v3657_v52, %v3661_v18 }
 0x35e   : > { %v3615_v29 = vpop.f32.mrf.mxu1 }
 0x35f   : > { %4304 = vst [vmem:[#allocation30_spill] sm:$0xff] %v3615_v29 }
 0x360   : > { %v3619_v31 = vpop.f32.mrf.mxu1 }
 0x361   : > { %947 = vmax.xlane.f32.xlu0 %v946_v30  ;;  %v3667_v30 = vpop.f32.mrf.mxu0 }
 0x362   : > { %v3621_v32 = vpop.f32.mrf.mxu1 }
 0x364   : > { %v3625_v34 = vpop.f32.mrf.mxu1 }
 0x365   : > { %1328 = vmax.xlane.f32.xlu0 %v1327_v33 }
 0x366   : > { %v3627_v35 = vpop.f32.mrf.mxu1 }
 0x368   : > { %v3631_v37 = vpop.f32.mrf.mxu1 }
 0x369   : > { %941 = vmax.xlane.f32.xlu0 %v940_v36 }
 0x36a   : > { %v3633_v38 = vpop.f32.mrf.mxu1 }
 0x36b   : > { %v958_v26 = vmax.f32 %v3631_v37, %v3633_v38 }
 0x36c   : > { %v3637_v42 = vpop.f32.mrf.mxu1 }
 0x36d   : > { %1322 = vmax.xlane.f32.xlu0 %v1321_v40 }
 0x36e   : > { %v3639_v44 = vpop.f32.mrf.mxu1 }
 0x370   : > { %v3643_v46 = vpop.f32.mrf.mxu1 }
 0x371   : > { %935 = vmax.xlane.f32.xlu0 %v934_v39  ;;  %v3675_v39 = vpop.f32.mrf.mxu0 }
 0x372   : > { %v3645_v47 = vpop.f32.mrf.mxu1  ;;  %v1360_v63 = vmax.f32 %v3667_v30, %v3675_v39 }
 0x373   : > { %v964_v53 = vmax.f32 %v3643_v46, %v3645_v47  ;;  %v3681_v62 = vpop.f32.mrf.mxu0 }
 0x374   : > { %v3647_v41 = vpop.f32.mrf.mxu1 }
 0x376   : > { %v3649_v48 = vpop.f32.mrf.mxu1 }
 0x377   : > { %v967_v57 = vmax.f32 %v3647_v41, %v3649_v48 }
 0x378   : > { %v3651_v49 = vpop.f32.mrf.mxu1 }
 0x37a   : > { %v3653_v50 = vpop.f32.mrf.mxu1 }
 0x37b   : > { %v970_v51 = vmax.f32 %v3651_v49, %v3653_v50 }
 0x37c   : > { %v3663_v24 = vpop.f32.mrf.mxu1 }
 0x37d   : > { %971 = vmax.xlane.f32.xlu1 %v970_v51 }
 0x37e   : > { %v3669_v33 = vpop.f32.mrf.mxu1 }
 0x37f   : > { %v973_v40 = vmax.f32 %v3663_v24, %v3669_v33 }
 0x380   : > { %v3671_v36 = vpop.f32.mrf.mxu1 }
 0x381   : > { %965 = vmax.xlane.f32.xlu1 %v964_v53 }
 0x382   : > { %v3677_v51 = vpop.f32.mrf.mxu1 }
 0x383   : > { %v976_v53 = vmax.f32 %v3671_v36, %v3677_v51 }
 0x384   : > { %v3687_v6 = vpop.f32.mrf.mxu1 }
 0x385   : > { %1358 = vmax.xlane.f32.xlu1 %v1357_v27  ;;  %v3685_v27 = vpop.f32.mrf.mxu0 }
 0x386   : > { %v1363_v55 = vmax.f32 %v3681_v62, %v3685_v27  ;;  %v3693_v54 = vpop.f32.mrf.mxu1 }
 0x387   : > { %v979_v16 = vmax.f32 %v3687_v6, %v3693_v54 }
 0x389   : > { %974 = vmax.xlane.f32.xlu1 %v973_v40  ;;  %v3691_v40 = vpop.f32.mrf.mxu0 }
 0x38d   : > { %977 = vmax.xlane.f32.xlu1 %v976_v53  ;;  %v3697_v53 = vpop.f32.mrf.mxu0 }
 0x38e   : > { %v1366_v13 = vmax.f32 %v3691_v40, %v3697_v53 }
 0x391   : > { %1361 = vmax.xlane.f32.xlu1 %v1360_v63  ;;  %v1930_v63 = vpack.c.bf16 %v3504_v22, %v3504_v22  ;;  %v961_v22 = vmax.f32 %v3637_v42, %v3639_v44 }
 0x395   : > { %1364 = vmax.xlane.f32.xlu1 %v1363_v55  ;;  %v1345_v55 = vmax.f32 %v3573_v7, %v3577_v8 }
 0x399   : > { %980 = vmax.xlane.f32.xlu1 %v979_v16  ;;  %v4305_v16 = vmov 0  }
 0x39d   : > { %1367 = vmax.xlane.f32.xlu1 %v1366_v13  ;;  %v1342_v13 = vmax.f32 %v3567_v4, %v3569_v5 }
 0x39e   : > { %1933 = vxpose.xlu0.c.b16.start.end [1/1] (short) %v1930_v63, 128  ;;  %v952_v63 = vmax.f32 %v3619_v31, %v3621_v32 }
 0x3a1   : > { %968 = vmax.xlane.f32.xlu1 %v967_v57  ;;  %v1339_v57 = vmax.f32 %v3563_v2, %v3565_v3 }
 0x3a5   : > { %1346 = vmax.xlane.f32.xlu1 %v1345_v55  ;;  %v949_v55 = vmax.f32 %v3613_v28, %v3615_v29 }
 0x3a7   : > { %2791 = vset.pattern.permute.xlu0 %v4305_v16 }
 0x3a9   : > { %1349 = vmax.xlane.f32.xlu1 %v1348_v45  ;;  %v955_v45 = vmax.f32 %v3625_v34, %v3627_v35 }
 0x3ad   : > { %959 = vmax.xlane.f32.xlu1 %v958_v26  ;;  %v1336_v26 = vmax.f32 %v3559_v60, %v3561_v61 }
 0x3b1   : > { %962 = vmax.xlane.f32.xlu1 %v961_v22  ;;  %v1330_v22 = vmax.f32 %v3551_v58, %v3553_v0 }
 0x3b5   : > { %1340 = vmax.xlane.f32.xlu1 %v1339_v57  ;;  %v943_v57 = vmax.f32 %v3597_v19, %v3601_v21 }
 0x3b9   : > { %1343 = vmax.xlane.f32.xlu1 %v1342_v13  ;;  %v1324_v13 = vmax.f32 %v3543_v56, %v3545_v43 }
 0x3bd   : > { %953 = vmax.xlane.f32.xlu1 %v952_v63  ;;  %v937_v63 = vmax.f32 %v3579_v9, %v3583_v11 }
 0x3c1   : > { %956 = vmax.xlane.f32.xlu1 %v955_v45  ;;  %v2801_v45 = vld [vmem:[#allocation3 + $0xc] ss:$16 sps:$4 sm:$0x1f]  }
 0x3c2   : > { %1526 = vmatprep.mubr.bf16.mxu0 %v2801_v45 }
 0x3c5   : > { %1337 = vmax.xlane.f32.xlu1 %v1336_v26  ;;  %v2806_v26 = vld [vmem:[#allocation3 + $0x4] ss:$56 sps:$4 sm:$0x1f]  }
 0x3c6   : > { %1138 = vmatprep.mubr.bf16.mxu1 %v2806_v26 }
 0x3c9   : > { %950 = vmax.xlane.f32.xlu1 %v949_v55 }
 0x3cd   : > { %1331 = vmax.xlane.f32.xlu1 %v1330_v22  ;;  %v1542_v22 = vpack.c.bf16 %v3501_v15, %v3501_v15 }
 0x3d1   : > { %944 = vmax.xlane.f32.xlu1 %v943_v57 }
 0x3d5   : > { %1325 = vmax.xlane.f32.xlu1 %v1324_v13 }
 0x3d9   : > { %938 = vmax.xlane.f32.xlu1 %v937_v63 }
 0x3de   : > { %v3734_v55 = vpop.xlane.xlu1 %1352 }
 0x406   : > { %v972_v0 = vpop.xlane.xlu1 %971  ;;  %1545 = vxpose.xlu1.c.b16.start.end [1/1] (short) %v1542_v22, 128 }
 0x407   : > { %v1007_v63 = vsub.f32 %v3653_v50, %v972_v0 }
 0x409   : > { %v1064_v15 = vmul.f32 1.442695, %v1007_v63 }
 0x40a   : > { %v3738_v57 = vpop.xlane.xlu1 %965  ;;  %2792 = vset.pattern.permute.xlu1 %v4305_v16 }
 0x40b   : > { %2817 = vpow2.f32 %v1064_v15 }
 0x40e   : > { %v3741_v13 = vpop.xlane.xlu1 %1358 }
 0x412   : > { %v975_v43 = vpop.xlane.xlu1 %974 }
 0x413   : > { %v1009_v26 = vsub.f32 %v3669_v33, %v975_v43 }
 0x415   : > { %v1068_v19 = vmul.f32 1.442695, %v1009_v26 }
 0x416   : > { %v978_v11 = vpop.xlane.xlu1 %977 }
 0x417   : > { %v1010_v9 = vsub.f32 %v3671_v36, %v978_v11  ;;  %v1011_v56 = vsub.f32 %v3677_v51, %v978_v11  ;;  %2819 = vpow2.f32 %v1068_v19  ;;  %v1006_v11 = vsub.f32 %v3651_v49, %v972_v0 }
 0x419   : > { %v1070_v58 = vmul.f32 1.442695, %v1010_v9  ;;  %v1072_v16 = vmul.f32 1.442695, %v1011_v56  ;;  %v1062_v0 = vmul.f32 1.442695, %v1006_v11 }
 0x41a   : > { %v1362_v45 = vpop.xlane.xlu1 %1361 }
 0x41b   : > { %v1396_v22 = vsub.f32 %v3675_v39, %v1362_v45  ;;  %2821 = vpow2.f32 %v1070_v58  ;;  %v1003_v58 = vsub.f32 %v3645_v47, %v3738_v57  ;;  %v1390_v47 = vsub.f32 %v3593_v17, %v3734_v55 }
 0x41c   : > { %2823 = vpow2.f32 %v1072_v16  ;;  %v1389_v17 = vsub.f32 %v3589_v14, %v3734_v55 }
 0x41d   : > { %v1455_v28 = vmul.f32 1.442695, %v1396_v22 }
 0x41e   : > { %v1365_v21 = vpop.xlane.xlu1 %1364  ;;  %v1441_v14 = vmul.f32 1.442695, %v1389_v17 }
 0x41f   : > { %v1397_v29 = vsub.f32 %v3681_v62, %v1365_v21  ;;  %v1398_v50 = vsub.f32 %v3685_v27, %v1365_v21  ;;  %v1394_v62 = vsub.f32 %v3661_v18, %v3741_v13  ;;  %2825 = vpow2.f32 %v1455_v28 }
 0x420   : > { %v1008_v21 = vsub.f32 %v3663_v24, %v975_v43  ;;  %v1395_v28 = vsub.f32 %v3667_v30, %v1362_v45 }
 0x421   : > { %v1457_v39 = vmul.f32 1.442695, %v1397_v29  ;;  %v1459_v56 = vmul.f32 1.442695, %v1398_v50  ;;  %v1451_v49 = vmul.f32 1.442695, %v1394_v62 }
 0x422   : > { %v981_v61 = vpop.xlane.xlu1 %980  ;;  %v1066_v24 = vmul.f32 1.442695, %v1008_v21  ;;  %v1453_v30 = vmul.f32 1.442695, %v1395_v28  ;;  %v1443_v50 = vmul.f32 1.442695, %v1390_v47 }
 0x423   : > { %v1012_v33 = vsub.f32 %v3687_v6, %v981_v61  ;;  %v1013_v36 = vsub.f32 %v3693_v54, %v981_v61  ;;  %v1356_v61 = vpop.xlane.xlu0 %1355 }
 0x424   : > { %v1392_v43 = vsub.f32 %v3603_v23, %v1356_v61  ;;  %v2818_v23 = vpop.eup %2817 }
 0x425   : > { %v1074_v51 = vmul.f32 1.442695, %v1012_v33  ;;  %v1076_v9 = vmul.f32 1.442695, %v1013_v36 }
 0x426   : > { %v1368_v63 = vpop.xlane.xlu1 %1367  ;;  %v1447_v15 = vmul.f32 1.442695, %v1392_v43 }
 0x427   : > { %2827 = vpow2.f32 %v1074_v51  ;;  %v1399_v6 = vsub.f32 %v3691_v40, %v1368_v63  ;;  %v1400_v54 = vsub.f32 %v3697_v53, %v1368_v63  ;;  %v1393_v40 = vsub.f32 %v3657_v52, %v3741_v13 }
 0x428   : > { %2829 = vpow2.f32 %v1076_v9  ;;  %v1056_v53 = vmul.f32 1.442695, %v1003_v58  ;;  %v1002_v52 = vsub.f32 %v3643_v46, %v3738_v57 }
 0x429   : > { %2831 = vpow2.f32 %v1457_v39  ;;  %v1461_v19 = vmul.f32 1.442695, %v1399_v6  ;;  %v1463_v29 = vmul.f32 1.442695, %v1400_v54  ;;  %v1449_v13 = vmul.f32 1.442695, %v1393_v40 }
 0x42a   : > { %2833 = vpow2.f32 %v1459_v56  ;;  %v969_v18 = vpop.xlane.xlu1 %968  ;;  %v1054_v57 = vmul.f32 1.442695, %v1002_v52 }
 0x42b   : > { %2835 = vpow2.f32 %v1461_v19  ;;  %v1005_v27 = vsub.f32 %v3649_v48, %v969_v18  ;;  %v1004_v45 = vsub.f32 %v3647_v41, %v969_v18  ;;  %v2820_v48 = vpop.eup %2819  ;;  %v1391_v41 = vsub.f32 %v3599_v20, %v1356_v61 }
 0x42c   : > { %2837 = vpow2.f32 %v1463_v29  ;;  %v2822_v22 = vpop.eup %2821  ;;  %v1335_v29 = vpop.xlane.xlu0 %1334 }
 0x42d   : > { %2839 = vpow2.f32 %v1062_v0  ;;  %v1060_v16 = vmul.f32 1.442695, %v1005_v27  ;;  %v2824_v33 = vpop.eup %2823  ;;  %v1058_v36 = vmul.f32 1.442695, %v1004_v45  ;;  %v1445_v63 = vmul.f32 1.442695, %v1391_v41 }
 0x42e   : > { %2841 = vpow2.f32 %v1451_v49  ;;  %v3768_v26 = vpop.xlane.xlu1 %1346  ;;  %v2826_v39 = vpop.eup %2825  ;;  %v1377_v52 = vsub.f32 %v3555_v1, %v1335_v29 }
 0x42f   : > { %2843 = vpow2.f32 %v1066_v24  ;;  %v1386_v51 = vsub.f32 %v3577_v8, %v3768_v26  ;;  %v1385_v45 = vsub.f32 %v3573_v7, %v3768_v26 }
 0x430   : > { %2845 = vpow2.f32 %v1060_v16 }
 0x431   : > { %2847 = vpow2.f32 %v1056_v53  ;;  %v1435_v54 = vmul.f32 1.442695, %v1386_v51  ;;  %v1433_v41 = vmul.f32 1.442695, %v1385_v45 }
 0x432   : > { %2849 = vpow2.f32 %v1453_v30  ;;  %v1350_v11 = vpop.xlane.xlu1 %1349 }
 0x433   : > { %2851 = vpow2.f32 %v1447_v15  ;;  %v1388_v9 = vsub.f32 %v3585_v12, %v1350_v11  ;;  %v1091_v12 = vpack.c.bf16 %v2820_v48, %v2818_v23 }
 0x434   : > { %v2828_v46 = vpop.eup %2827  ;;  %2853 = vpow2.f32 %v1449_v13 }
 0x435   : > { %v2830_v62 = vpop.eup %2829  ;;  %2855 = vpow2.f32 %v1443_v50  ;;  %v1092_v55 = vpack.c.bf16 %v2828_v46, %v2822_v22  ;;  %v1439_v58 = vmul.f32 1.442695, %v1388_v9 }
 0x436   : > { %v2832_v56 = vpop.eup %2831  ;;  %2857 = vpow2.f32 %v1058_v36  ;;  %v960_v20 = vpop.xlane.xlu1 %959  ;;  %v1093_v21 = vpack.c.bf16 %v2830_v62, %v2824_v33  ;;  %v1378_v33 = vsub.f32 %v3557_v59, %v1335_v29  ;;  %v1417_v36 = vmul.f32 1.442695, %v1377_v52  ;;  %v4309_v52 = vld [vmem:[#allocation19_spill] sm:$0xff] }
 0x437   : > { %v2834_v6 = vpop.eup %2833  ;;  %v998_v61 = vsub.f32 %v3631_v37, %v960_v20  ;;  %v999_v8 = vsub.f32 %v3633_v38, %v960_v20  ;;  %2859 = vpow2.f32 %v1054_v57  ;;  %v1387_v38 = vsub.f32 %v3581_v10, %v1350_v11 }
 0x438   : > { %v2836_v0 = vpop.eup %2835  ;;  %1106 = vmatprep.subr.bf16.mxu1 %v1093_v21  ;;  %2861 = vpow2.f32 %v1441_v14 }
 0x439   : > { %v2838_v19 = vpop.eup %2837  ;;  %v1046_v49 = vmul.f32 1.442695, %v998_v61  ;;  %1107 = vmatpush1.bf16.xpose.msra.mxu1 %v1092_v55  ;;  %v1479_v28 = vpack.c.bf16 %v2836_v0, %v2832_v56  ;;  %2863 = vpow2.f32 %v1445_v63  ;;  %v1048_v43 = vmul.f32 1.442695, %v999_v8 }
 0x43a   : > { %v2840_v18 = vpop.eup %2839  ;;  %1108 = vmatprep.subr.bf16.mxu1 %v1091_v12  ;;  %v963_v24 = vpop.xlane.xlu1 %962  ;;  %v1480_v27 = vpack.c.bf16 %v2838_v19, %v2834_v6  ;;  %2865 = vpow2.f32 %v1435_v54  ;;  %v1437_v13 = vmul.f32 1.442695, %v1387_v38  ;;  %v1419_v55 = vmul.f32 1.442695, %v1378_v33  ;;  %v4306_v19 = vld [vmem:[#allocation28_spill] sm:$0xff]  ;;  %v4311_v33 = vld [vmem:[#allocation25_spill] sm:$0xff] }
 0x43b   : > { %v2842_v37 = vpop.eup %2841  ;;  %v1000_v40 = vsub.f32 %v3637_v42, %v963_v24  ;;  %v1001_v47 = vsub.f32 %v3639_v44, %v963_v24  ;;  %2867 = vpow2.f32 %v1439_v58  ;;  %v3786_v44 = vpop.xlane.xlu0 %947 }
 0x43c   : > { %v2844_v53 = vpop.eup %2843  ;;  %1494 = vmatprep.subr.bf16.mxu0 %v1480_v27  ;;  %v1478_v16 = vpack.c.bf16 %v2826_v39, %v2842_v37  ;;  %2869 = vpow2.f32 %v1046_v49  ;;  %v990_v11 = vsub.f32 %v3607_v25, %v3786_v44  ;;  %v991_v29 = vsub.f32 %v4306_v19, %v3786_v44  ;;  %v4307_v27 = vld [vmem:[#allocation15_spill] sm:$0xff]  ;;  %v4317_v19 = vld [vmem:[#allocation12_spill] sm:$0xff] }
 0x43d   : > { %v2846_v30 = vpop.eup %2845  ;;  %v1050_v23 = vmul.f32 1.442695, %v1000_v40  ;;  %v1052_v15 = vmul.f32 1.442695, %v1001_v47  ;;  %1495 = vmatpush1.bf16.xpose.msra.mxu0 %v1479_v28  ;;  %2871 = vpow2.f32 %v1048_v43  ;;  %v1090_v17 = vpack.c.bf16 %v2844_v53, %v2840_v18 }
 0x43e   : > { %v2848_v48 = vpop.eup %2847  ;;  %1496 = vmatprep.subr.bf16.mxu0 %v1478_v16  ;;  %v1341_v10 = vpop.xlane.xlu1 %1340  ;;  %v1030_v25 = vmul.f32 1.442695, %v990_v11  ;;  %v1032_v45 = vmul.f32 1.442695, %v991_v29  ;;  %v4312_v11 = vld [vmem:[#allocation29_spill] sm:$0xff] }
 0x43f   : > { %v2850_v42 = vpop.eup %2849  ;;  %2873 = vpow2.f32 %v1050_v23  ;;  %v1382_v22 = vsub.f32 %v3565_v3, %v1341_v10  ;;  %v1089_v7 = vpack.c.bf16 %v2846_v30, %v2848_v48  ;;  %v1381_v62 = vsub.f32 %v3563_v2, %v1341_v10  ;;  %v1329_v54 = vpop.xlane.xlu0 %1328  ;;  %v4308_v23 = vld [vmem:[#allocation16_spill] sm:$0xff] }
 0x440   : > { %v2852_v50 = vpop.eup %2851  ;;  %2875 = vpow2.f32 %v1052_v15  ;;  %v1373_v37 = vsub.f32 %v4307_v27, %v1329_v54  ;;  %v1374_v15 = vsub.f32 %v4308_v23, %v1329_v54  ;;  %v4315_v54 = vld [vmem:[#allocation17_spill] sm:$0xff] }
 0x441   : > { %v2854_v26 = vpop.eup %2853  ;;  %1109 = vmatpush1.bf16.xpose.msra.mxu1 %v1090_v17  ;;  %2877 = vpow2.f32 %v1437_v13  ;;  %v1427_v3 = vmul.f32 1.442695, %v1382_v22  ;;  %v1425_v8 = vmul.f32 1.442695, %v1381_v62  ;;  %v4310_v13 = vld [vmem:[#allocation24_spill] sm:$0xff] }
 0x442   : > { %v2856_v1 = vpop.eup %2855  ;;  %1110 = vmatprep.subr.bf16.mxu1 %v1089_v7  ;;  %v1344_v39 = vpop.xlane.xlu1 %1343  ;;  %v1477_v51 = vpack.c.bf16 %v2850_v42, %v2854_v26  ;;  %2879 = vpow2.f32 %v1433_v41  ;;  %v1409_v44 = vmul.f32 1.442695, %v1373_v37  ;;  %v1411_v26 = vmul.f32 1.442695, %v1374_v15  ;;  %v4321_v15 = vld [vmem:[#allocation21_spill] sm:$0xff] }
 0x443   : > { %v2858_v46 = vpop.eup %2857  ;;  %v1383_v57 = vsub.f32 %v3567_v4, %v1344_v39  ;;  %v1384_v9 = vsub.f32 %v3569_v5, %v1344_v39  ;;  %v1476_v59 = vpack.c.bf16 %v2852_v50, %v2856_v1  ;;  %2881 = vpow2.f32 %v1417_v36  ;;  %v942_v47 = vpop.xlane.xlu0 %941 }
 0x444   : > { %v2860_v14 = vpop.eup %2859  ;;  %2883 = vpow2.f32 %v1427_v3  ;;  %v986_v22 = vsub.f32 %v4310_v13, %v942_v47  ;;  %v987_v41 = vsub.f32 %v4311_v33, %v942_v47  ;;  %v4320_v47 = vld [vmem:[#allocation20_spill] sm:$0xff] }
 0x445   : > { %v1431_v56 = vmul.f32 1.442695, %v1384_v9  ;;  %1497 = vmatpush1.bf16.xpose.msra.mxu0 %v1477_v51  ;;  %v2862_v63 = vpop.eup %2861  ;;  %v1088_v21 = vpack.c.bf16 %v2858_v46, %v2860_v14  ;;  %v1429_v4 = vmul.f32 1.442695, %v1383_v57  ;;  %v4313_v51 = vld [vmem:[#allocation30_spill] sm:$0xff] }
 0x446   : > { %1498 = vmatprep.subr.bf16.mxu0 %v1476_v59  ;;  %v954_v20 = vpop.xlane.xlu1 %953  ;;  %v2864_v6 = vpop.eup %2863  ;;  %v1022_v62 = vmul.f32 1.442695, %v986_v22 }
 0x447   : > { %v994_v5 = vsub.f32 %v3619_v31, %v954_v20  ;;  %v995_v2 = vsub.f32 %v3621_v32, %v954_v20  ;;  %v2866_v61 = vpop.eup %2865  ;;  %2885 = vpow2.f32 %v1431_v56  ;;  %v1475_v43 = vpack.c.bf16 %v2864_v6, %v2862_v63  ;;  %v4314_v63 = vld [vmem:[#allocation11_spill] sm:$0xff] }
 0x448   : > { %v2868_v0 = vpop.eup %2867  ;;  %2887 = vpow2.f32 %v1419_v55  ;;  %v1024_v56 = vmul.f32 1.442695, %v987_v41 }
 0x449   : > { %v1038_v58 = vmul.f32 1.442695, %v994_v5  ;;  %1111 = vmatpush1.bf16.xpose.msra.mxu1 %v1088_v21  ;;  %v2870_v12 = vpop.eup %2869  ;;  %2889 = vpow2.f32 %v1030_v25  ;;  %v1040_v49 = vmul.f32 1.442695, %v995_v2  ;;  %v1474_v38 = vpack.c.bf16 %v2868_v0, %v2866_v61  ;;  %v4316_v5 = vld [vmem:[#allocation18_spill] sm:$0xff] }
 0x44a   : > { %v957_v28 = vpop.xlane.xlu1 %956  ;;  %v2872_v18 = vpop.eup %2871  ;;  %2891 = vpow2.f32 %v1429_v4 }
 0x44b   : > { %v996_v31 = vsub.f32 %v3625_v34, %v957_v28  ;;  %v997_v32 = vsub.f32 %v3627_v35, %v957_v28  ;;  %2893 = vpow2.f32 %v1425_v8 }
 0x44c   : > { %v2874_v24 = vpop.eup %2873  ;;  %2895 = vpow2.f32 %v1038_v58 }
 0x44d   : > { %v2876_v40 = vpop.eup %2875  ;;  %v1042_v53 = vmul.f32 1.442695, %v996_v31  ;;  %v1044_v16 = vmul.f32 1.442695, %v997_v32  ;;  %1499 = vmatpush1.bf16.xpose.msra.mxu0 %v1475_v43  ;;  %v1086_v30 = vpack.c.bf16 %v2874_v24, %v2870_v12  ;;  %2897 = vpow2.f32 %v1040_v49  ;;  %v4318_v32 = vld [vmem:[#allocation26_spill] sm:$0xff]  ;;  %v4319_v24 = vld [vmem:[#allocation27_spill] sm:$0xff] }
 0x44e   : > { %1500 = vmatprep.subr.bf16.mxu0 %v1474_v38  ;;  %v1338_v34 = vpop.xlane.xlu1 %1337  ;;  %v1087_v35 = vpack.c.bf16 %v2876_v40, %v2872_v18  ;;  %v2878_v42 = vpop.eup %2877 }
 0x44f   : > { %2899 = vpow2.f32 %v1042_v53  ;;  %v1379_v48 = vsub.f32 %v3559_v60, %v1338_v34  ;;  %v1380_v10 = vsub.f32 %v4309_v52, %v1338_v34  ;;  %v2880_v7 = vpop.eup %2879  ;;  %v1323_v60 = vpop.xlane.xlu0 %1322 }
 0x450   : > { %2901 = vpow2.f32 %v1044_v16  ;;  %1112 = vmatprep.subr.bf16.mxu1 %v1087_v35  ;;  %v3807_v36 = vpop.eup %2881  ;;  %v1473_v3 = vpack.c.bf16 %v2878_v42, %v2880_v7  ;;  %v1369_v25 = vsub.f32 %v4314_v63, %v1323_v60  ;;  %v1370_v29 = vsub.f32 %v4317_v19, %v1323_v60 }
 0x451   : > { %v1421_v17 = vmul.f32 1.442695, %v1379_v48  ;;  %v1423_v50 = vmul.f32 1.442695, %v1380_v10  ;;  %1113 = vmatpush1.bf16.xpose.msra.mxu1 %v1086_v30  ;;  %2903 = vpow2.f32 %v1032_v45  ;;  %v2884_v57 = vpop.eup %2883  ;;  %v4322_v10 = vld [vmem:[#allocation13_spill] sm:$0xff] }
 0x452   : > { %v951_v1 = vpop.xlane.xlu1 %950  ;;  %v1401_v49 = vmul.f32 1.442695, %v1369_v25  ;;  %v1403_v23 = vmul.f32 1.442695, %v1370_v29 }
 0x453   : > { %2905 = vpow2.f32 %v1421_v17  ;;  %v992_v39 = vsub.f32 %v4312_v11, %v951_v1  ;;  %v993_v46 = vsub.f32 %v4313_v51, %v951_v1  ;;  %v936_v28 = vpop.xlane.xlu0 %935  ;;  %v4324_v51 = vld [vmem:[#allocation22_spill] sm:$0xff] }
 0x454   : > { %2907 = vpow2.f32 %v1423_v50  ;;  %v2886_v9 = vpop.eup %2885  ;;  %v982_v53 = vsub.f32 %v4320_v47, %v936_v28  ;;  %v983_v34 = vsub.f32 %v4321_v15, %v936_v28 }
 0x455   : > { %2909 = vpow2.f32 %v1409_v44  ;;  %v1034_v59 = vmul.f32 1.442695, %v992_v39  ;;  %v1036_v14 = vmul.f32 1.442695, %v993_v46  ;;  %1501 = vmatpush1.bf16.xpose.msra.mxu0 %v1473_v3  ;;  %v3811_v55 = vpop.eup %2887  ;;  %v1472_v21 = vpack.c.bf16 %v2886_v9, %v2884_v57  ;;  %v4323_v44 = vld [vmem:[#allocation14_spill] sm:$0xff]  ;;  %v4325_v3 = vld [vmem:[#allocation23_spill] sm:$0xff] }
 0x456   : > { %2911 = vpow2.f32 %v1411_v26  ;;  %v1332_v20 = vpop.xlane.xlu1 %1331  ;;  %v3814_v6 = vpop.eup %2889  ;;  %v1014_v50 = vmul.f32 1.442695, %v982_v53  ;;  %v1016_v1 = vmul.f32 1.442695, %v983_v34 }
 0x457   : > { %2913 = vpow2.f32 %v1034_v59  ;;  %v1375_v4 = vsub.f32 %v4315_v54, %v1332_v20  ;;  %v1376_v2 = vsub.f32 %v4316_v5, %v1332_v20  ;;  %v2892_v61 = vpop.eup %2891  ;;  %1502 = vmatprep.subr.bf16.mxu0 %v1472_v21 }
 0x458   : > { %2915 = vpow2.f32 %v1036_v14  ;;  %v2894_v8 = vpop.eup %2893 }
 0x459   : > { %2917 = vpow2.f32 %v1022_v62  ;;  %v1413_v0 = vmul.f32 1.442695, %v1375_v4  ;;  %v1415_v58 = vmul.f32 1.442695, %v1376_v2  ;;  %v2896_v12 = vpop.eup %2895  ;;  %v1471_v37 = vpack.c.bf16 %v2892_v61, %v2894_v8 }
 0x45a   : > { %2919 = vpow2.f32 %v1024_v56  ;;  %v945_v18 = vpop.xlane.xlu1 %944  ;;  %v2898_v31 = vpop.eup %2897 }
 0x45b   : > { %2921 = vpow2.f32 %v1413_v0  ;;  %v988_v43 = vsub.f32 %v4318_v32, %v945_v18  ;;  %v989_v27 = vsub.f32 %v4319_v24, %v945_v18  ;;  %v1932_v0 = vld [vmem:[#allocation2 + $0x8] sm:$0xff] }
 0x45c   : > { %v2900_v38 = vpop.eup %2899  ;;  %2923 = vpow2.f32 %v1415_v58  ;;  %v2628_v28 = vcombine.high %v1932_v0, %v1932_v0 }
 0x45d   : > { %v2902_v40 = vpop.eup %2901  ;;  %v1026_v16 = vmul.f32 1.442695, %v988_v43  ;;  %v1028_v30 = vmul.f32 1.442695, %v989_v27  ;;  %1503 = vmatpush1.bf16.xpose.msra.mxu0 %v1471_v37  ;;  %v1084_v45 = vpack.c.bf16 %v2900_v38, %v2896_v12  ;;  %2925 = vpow2.f32 %v1401_v49 }
 0x45e   : > { %v1326_v35 = vpop.xlane.xlu1 %1325  ;;  %v1085_v48 = vpack.c.bf16 %v2902_v40, %v2898_v31  ;;  %v2904_v52 = vpop.eup %2903  ;;  %v1544_v31 = vld [vmem:[#allocation2 + $0x18] sm:$0xff]  ;;  %v2627_v37 = vcombine.low %v1932_v0, %v1932_v0 }
 0x45f   : > { %2927 = vpow2.f32 %v1026_v16  ;;  %v1371_v42 = vsub.f32 %v4322_v10, %v1326_v35  ;;  %v1372_v13 = vsub.f32 %v4323_v44, %v1326_v35  ;;  %v2615_v38 = vcombine.high %v1544_v31, %v1544_v31  ;;  %v2799_v40 = vld [vmem:[#allocation3 + $0x8] ss:$16 sps:$4 sm:$0x1f]  }
 0x460   : > { %v2906_v22 = vpop.eup %2905  ;;  %2929 = vpow2.f32 %v1028_v30  ;;  %1114 = vmatprep.subr.bf16.mxu1 %v1085_v48  ;;  %v1979_v47 = vsel %vm814_vm9, %v2627_v37, 0  ;;  %v2614_v53 = vcombine.low %v1544_v31, %v1544_v31  ;;  %v2804_v16 = vld [vmem:[#allocation3] ss:$56 sps:$4 sm:$0x1f]   ;;  %v4326_v30 = vmov 0  }
 0x461   : > { %v2908_v17 = vpop.eup %2907  ;;  %v1405_v7 = vmul.f32 1.442695, %v1371_v42  ;;  %v1407_v26 = vmul.f32 1.442695, %v1372_v13  ;;  %1115 = vmatpush1.bf16.xpose.msra.mxu1 %v1084_v45  ;;  %v1469_v33 = vpack.c.bf16 %v2906_v22, %v3807_v36  ;;  %2931 = vpow2.f32 %v1403_v23  ;;  %v1941_v23 = vpop.trf.xlu0 }
 0x462   : > { %v2910_v41 = vpop.eup %2909  ;;  %v939_v60 = vpop.xlane.xlu1 %938  ;;  %v1470_v11 = vpack.c.bf16 %v2908_v17, %v3811_v55  ;;  %v1591_v45 = vsel %vm814_vm9, %v2614_v53, 0 }
 0x463   : > { %v2912_v39 = vpop.eup %2911  ;;  %2933 = vpow2.f32 %v1405_v7  ;;  %v984_v46 = vsub.f32 %v4324_v51, %v939_v60  ;;  %v985_v57 = vsub.f32 %v4325_v3, %v939_v60 }
 0x464   : > { %v2914_v9 = vpop.eup %2913  ;;  %2935 = vpow2.f32 %v1407_v26  ;;  %1504 = vmatprep.subr.bf16.mxu0 %v1470_v11 }
 0x465   : > { %v2916_v62 = vpop.eup %2915  ;;  %2937 = vpow2.f32 %v1014_v50  ;;  %v1018_v59 = vmul.f32 1.442695, %v984_v46  ;;  %v1020_v14 = vmul.f32 1.442695, %v985_v57  ;;  %1505 = vmatpush1.bf16.xpose.msra.mxu0 %v1469_v33  ;;  %v1082_v36 = vpack.c.bf16 %v2914_v9, %v3814_v6  ;;  %v1942_v34 = vpop.trf.xlu0 }
 0x466   : > { %v2918_v56 = vpop.eup %2917  ;;  %2939 = vpow2.f32 %v1016_v1  ;;  %v1083_v63 = vpack.c.bf16 %v2916_v62, %v2904_v52  ;;  %v1148_v46 = vlaneseq }
 0x467   : > { %v2920_v55 = vpop.eup %2919  ;;  %2941 = vpow2.f32 %v1018_v59 }
 0x468   : > { %v2922_v25 = vpop.eup %2921  ;;  %2943 = vpow2.f32 %v1020_v14  ;;  %1116 = vmatprep.subr.bf16.mxu1 %v1083_v63  ;;  %v1553_v15 = vpop.trf.xlu1  ;;  %v1149_v59 = vshrl.u32 %v1148_v46, 7 }
 0x469   : > { %v2924_v20 = vpop.eup %2923  ;;  %1117 = vmatpush1.bf16.xpose.msra.mxu1 %v1082_v36  ;;  %v1467_v21 = vpack.c.bf16 %v2922_v25, %v2910_v41  ;;  %v1943_v48 = vpop.trf.xlu0 }
 0x46a   : > { %v1468_v54 = vpack.c.bf16 %v2924_v20, %v2912_v39  ;;  %v2926_v4 = vpop.eup %2925 }
 0x46c   : > { %v2928_v5 = vpop.eup %2927  ;;  %1506 = vmatprep.subr.bf16.mxu0 %v1468_v54  ;;  %v1554_v35 = vpop.trf.xlu1 }
 0x46d   : > { %v2930_v2 = vpop.eup %2929  ;;  %1507 = vmatpush1.bf16.xpose.msra.mxu0 %v1467_v21  ;;  %v1080_v61 = vpack.c.bf16 %v2928_v5, %v2918_v56  ;;  %v1944_v10 = vpop.trf.xlu0 }
 0x46e   : > { %v1081_v8 = vpack.c.bf16 %v2930_v2, %v2920_v55  ;;  %v2932_v6 = vpop.eup %2931  ;;  %v3878_v55 = vsub.s32 0, %v1149_v59 }
 0x470   : > { %v2934_v58 = vpop.eup %2933  ;;  %1118 = vmatprep.subr.bf16.mxu1 %v1081_v8  ;;  %v1555_v52 = vpop.trf.xlu1  ;;  %4333 = vst [vmem:[#allocation29_spill] sm:$0xff] %v3878_v55 }
 0x471   : > { %v2936_v12 = vpop.eup %2935  ;;  %1119 = vmatpush1.bf16.xpose.msra.mxu1 %v1080_v61  ;;  %v1465_v19 = vpack.c.bf16 %v2934_v58, %v2926_v4  ;;  %v1945_v44 = vpop.trf.xlu0 }
 0x472   : > { %v2938_v29 = vpop.eup %2937  ;;  %v1466_v49 = vpack.c.bf16 %v2936_v12, %v2932_v6 }
 0x473   : > { %v2940_v18 = vpop.eup %2939 }
 0x474   : > { %v2942_v32 = vpop.eup %2941  ;;  %1508 = vmatprep.subr.bf16.mxu0 %v1466_v49  ;;  %v1556_v42 = vpop.trf.xlu1 }
 0x475   : > { %v2944_v43 = vpop.eup %2943  ;;  %1509 = vmatpush1.bf16.xpose.msra.mxu0 %v1465_v19  ;;  %v1078_v24 = vpack.c.bf16 %v2942_v32, %v2938_v29  ;;  %v1946_v22 = vpop.trf.xlu0 }
 0x476   : > { %v1079_v27 = vpack.c.bf16 %v2944_v43, %v2940_v18  ;;  %2629 = vmatprep.subr.msk.bf16.mxu0 %vm814_vm9, %v2628_v28 }
 0x478   : > { %1120 = vmatprep.subr.bf16.mxu1 %v1079_v27  ;;  %v1557_v13 = vpop.trf.xlu1 }
 0x479   : > { %1121 = vmatpush1.bf16.xpose.msra.mxu1 %v1078_v24  ;;  %v1947_v50 = vpop.trf.xlu0 }
 0x47a   : > { %2616 = vmatprep.subr.msk.bf16.mxu1 %vm814_vm9, %v2615_v38 }
 0x47c   : > { %1527 = vmatmul.mubr.bf16.vlgmr.msra.gmra.mxu0 %v2799_v40  ;;  %v1558_v17 = vpop.trf.xlu1 }
 0x47d   : > { %1999 = vmatpush1.bf16.msra.mxu0 %v1979_v47  ;;  %2016 = vmatprep.mubr.bf16.mxu0 %v4326_v30  ;;  %v1948_v26 = vpop.trf.xlu0 }
 0x480   : > { %1139 = vmatmul.mubr.bf16.vlgmr.msra.gmra.mxu1 %v2804_v16  ;;  %v1559_v7 = vpop.trf.xlu1 }
 0x481   : > { %1611 = vmatpush1.bf16.msra.mxu1 %v1591_v45  ;;  %1628 = vmatprep.mubr.bf16.mxu1 %v4326_v30 }
 0x484   : > { %2630 = vmatmul.mubr.msk.bf16.vlgmr.msra.gmra.mxu0 %vm789_vm10, %v1941_v23  ;;  %v1560_v33 = vpop.trf.xlu1 }
 0x485   : > { %2026 = vmatprep.mubr.bf16.mxu0 %v4326_v30 }
 0x488   : > { %2617 = vmatmul.mubr.msk.bf16.vlgmr.msra.gmra.mxu1 %vm789_vm10, %v1553_v15 }
 0x489   : > { %1638 = vmatprep.mubr.bf16.mxu1 %v4326_v30 }
 0x48c   : > { %2631 = vmatmul.mubr.msk.bf16.gmra.mxu0 %vm789_vm10, %v1942_v34 }
 0x48d   : > { %2036 = vmatprep.mubr.bf16.mxu0 %v4326_v30 }
 0x490   : > { %2618 = vmatmul.mubr.msk.bf16.gmra.mxu1 %vm789_vm10, %v1554_v35 }
 0x491   : > { %1648 = vmatprep.mubr.bf16.mxu1 %v4326_v30 }
 0x494   : > { %2632 = vmatmul.mubr.msk.bf16.gmra.mxu0 %vm789_vm10, %v1943_v48 }
 0x495   : > { %2046 = vmatprep.mubr.bf16.mxu0 %v4326_v30 }
 0x498   : > { %2619 = vmatmul.mubr.msk.bf16.gmra.mxu1 %vm789_vm10, %v1555_v52 }
 0x499   : > { %1658 = vmatprep.mubr.bf16.mxu1 %v4326_v30 }
 0x49c   : > { %2633 = vmatmul.mubr.msk.bf16.gmra.mxu0 %vm789_vm10, %v1944_v10 }
 0x49d   : > { %2056 = vmatprep.mubr.bf16.mxu0 %v4326_v30 }
 0x4a0   : > { %2620 = vmatmul.mubr.msk.bf16.gmra.mxu1 %vm789_vm10, %v1556_v42 }
 0x4a1   : > { %1668 = vmatprep.mubr.bf16.mxu1 %v4326_v30 }
 0x4a4   : > { %2634 = vmatmul.mubr.msk.bf16.gmra.mxu0 %vm789_vm10, %v1945_v44 }
 0x4a5   : > { %2066 = vmatprep.mubr.bf16.mxu0 %v4326_v30 }
 0x4a8   : > { %2621 = vmatmul.mubr.msk.bf16.gmra.mxu1 %vm789_vm10, %v1557_v13 }
 0x4a9   : > { %1678 = vmatprep.mubr.bf16.mxu1 %v4326_v30 }
 0x4ac   : > { %2635 = vmatmul.mubr.msk.bf16.gmra.mxu0 %vm789_vm10, %v1946_v22 }
 0x4ad   : > { %2076 = vmatprep.mubr.bf16.mxu0 %v4326_v30 }
 0x4b0   : > { %2622 = vmatmul.mubr.msk.bf16.gmra.mxu1 %vm789_vm10, %v1558_v17 }
 0x4b1   : > { %1688 = vmatprep.mubr.bf16.mxu1 %v4326_v30 }
 0x4b4   : > { %2636 = vmatmul.mubr.msk.bf16.gmra.mxu0 %vm789_vm10, %v1947_v50 }
 0x4b5   : > { %2086 = vmatprep.mubr.bf16.mxu0 %v4326_v30 }
 0x4b8   : > { %2623 = vmatmul.mubr.msk.bf16.gmra.mxu1 %vm789_vm10, %v1559_v7 }
 0x4b9   : > { %1698 = vmatprep.mubr.bf16.mxu1 %v4326_v30 }
 0x4bc   : > { %2637 = vmatmul.mubr.msk.bf16.gmra.mxu0 %vm789_vm10, %v1948_v26 }
 0x4c0   : > { %2624 = vmatmul.mubr.msk.bf16.gmra.mxu1 %vm789_vm10, %v1560_v33 }
 0x53c   : > { %v1528_v41 = vpop.f32.mrf.mxu0 }
 0x53e   : > { %v1530_v1 = vpop.f32.mrf.mxu0 }
 0x540   : > { %v1140_v60 = vpop.f32.mrf.mxu1  ;;  %v1531_v11 = vpop.f32.mrf.mxu0 }
 0x541   : > { %2945 = vrcp.f32 %v1531_v11 }
 0x542   : > { %v1142_v39 = vpop.f32.mrf.mxu1  ;;  %v1533_v51 = vpop.f32.mrf.mxu0 }
 0x544   : > { %v1143_v3 = vpop.f32.mrf.mxu1  ;;  %v3866_v57 = vpop.f32.mrf.mxu0 }
 0x545   : > { %4327 = vst [vmem:[#allocation28_spill] sm:$0xff] %v3866_v57  ;;  %2947 = vrcp.f32 %v1143_v3 }
 0x546   : > { %v1145_v9 = vpop.f32.mrf.mxu1  ;;  %v3868_v62 = vpop.f32.mrf.mxu0 }
 0x547   : > { %4328 = vst [vmem:[#allocation15_spill] sm:$0xff] %v3868_v62 }
 0x548   : > { %v3870_v14 = vpop.f32.mrf.mxu1  ;;  %v3872_v36 = vpop.f32.mrf.mxu0 }
 0x549   : > { %4329 = vst [vmem:[#allocation16_spill] sm:$0xff] %v3870_v14  ;;  %4330 = vst [vmem:[#allocation19_spill] sm:$0xff] %v3872_v36 }
 0x54a   : > { %v3874_v56 = vpop.f32.mrf.mxu1  ;;  %v3876_v63 = vpop.f32.mrf.mxu0 }
 0x54b   : > { %4331 = vst [vmem:[#allocation24_spill] sm:$0xff] %v3874_v56  ;;  %4332 = vst [vmem:[#allocation25_spill] sm:$0xff] %v3876_v63 }
 0x54c   : > { %v3880_v25 = vpop.f32.mrf.mxu1  ;;  %v3882_v20 = vpop.f32.mrf.mxu0 }
 0x54d   : > { %4334 = vst [vmem:[#allocation30_spill] sm:$0xff] %v3880_v25 }
 0x54e   : > { %v2946_v21 = vpop.eup %2945  ;;  %v3884_v54 = vpop.f32.mrf.mxu1 }
 0x54f   : > { %4335 = vst [vmem:[#allocation11_spill] sm:$0xff] %v3884_v54  ;;  %v3886_v4 = vpop.f32.mrf.mxu0  ;;  %v1539_v5 = vrot.slane %v2946_v21, %v3878_v55 }
 0x550   : > { %v3889_v2 = vpop.f32.mrf.mxu1 }
 0x551   : > { %4336 = vst [vmem:[#allocation17_spill] sm:$0xff] %v3889_v2  ;;  %v3891_v61 = vpop.f32.mrf.mxu0  ;;  %v1540_v8 = vmul.f32 %v1539_v5, %v1528_v41 }
 0x552   : > { %4337 = vst [vmem:[#allocation18_spill] sm:$0xff] %v3891_v61  ;;  %v2948_v6 = vpop.eup %2947  ;;  %v3893_v0 = vpop.f32.mrf.mxu1 }
 0x553   : > { %4338 = vst [vmem:[#allocation12_spill] sm:$0xff] %v3893_v0  ;;  %v3895_v58 = vpop.f32.mrf.mxu0  ;;  %v1151_v12 = vrot.slane %v2948_v6, %v3878_v55  ;;  %v1541_v19 = vpack.c.bf16 %v1540_v8, %v1540_v8 }
 0x554   : > { %4339 = vst [vmem:[#allocation26_spill] sm:$0xff] %v3895_v58  ;;  %v3898_v29 = vpop.f32.mrf.mxu1 }
 0x555   : > { %4340 = vst [vmem:[#allocation27_spill] sm:$0xff] %v3898_v29  ;;  %v3900_v49 = vpop.f32.mrf.mxu0  ;;  %v1152_v28 = vmul.f32 %v1151_v12, %v1140_v60  ;;  %v2319_v43 = vrot.slane %v1541_v19, 4 }
 0x556   : > { %v3902_v18 = vpop.f32.mrf.mxu1 }
 0x557   : > { %4341 = vst [vmem:[#allocation20_spill] sm:$0xff] %v3902_v18  ;;  %v3904_v31 = vpop.f32.mrf.mxu0  ;;  %v1153_v32 = vpack.c.bf16 %v1152_v28, %v1152_v28 }
 0x558   : > { %v3906_v24 = vpop.f32.mrf.mxu1 }
 0x559   : > { %v3908_v27 = vpop.f32.mrf.mxu0  ;;  %v3911_v37 = vsel %vm814_vm9, %v1153_v32, %v2319_v43 }
 0x55a   : > { %4342 = vst [vmem:[#allocation21_spill] sm:$0xff] %v3911_v37  ;;  %v3913_v38 = vpop.f32.mrf.mxu1 }
 0x55b   : > { %v3915_v40 = vpop.f32.mrf.mxu0 }
 0x55c   : > { %v3917_v47 = vpop.f32.mrf.mxu1 }
 0x55d   : > { %v3919_v53 = vpop.f32.mrf.mxu0 }
 0x55e   : > { %v3921_v16 = vpop.f32.mrf.mxu1 }
 0x55f   : > { %4343 = vst [vmem:[#allocation13_spill] sm:$0xff] %v3921_v16  ;;  %v3923_v30 = vpop.f32.mrf.mxu0 }
 0x560   : > { %v3925_v45 = vpop.f32.mrf.mxu1 }
 0x561   : > { %v3927_v23 = vpop.f32.mrf.mxu0 }
 0x562   : > { %v3929_v15 = vpop.f32.mrf.mxu1 }
 0x563   : > { %v3931_v34 = vpop.f32.mrf.mxu0 }
 0x564   : > { %v3933_v35 = vpop.f32.mrf.mxu1 }
 0x565   : > { %v3935_v48 = vpop.f32.mrf.mxu0 }
 0x566   : > { %v3937_v52 = vpop.f32.mrf.mxu1 }
 0x567   : > { %v3939_v10 = vpop.f32.mrf.mxu0 }
 0x568   : > { %v3941_v42 = vpop.f32.mrf.mxu1 }
 0x569   : > { %v3943_v44 = vpop.f32.mrf.mxu0 }
 0x56a   : > { %v3945_v13 = vpop.f32.mrf.mxu1 }
 0x56b   : > { %v3947_v22 = vpop.f32.mrf.mxu0 }
 0x56c   : > { %v3949_v17 = vpop.f32.mrf.mxu1 }
 0x56d   : > { %v3951_v50 = vpop.f32.mrf.mxu0 }
 0x56e   : > { %v3953_v7 = vpop.f32.mrf.mxu1 }
 0x56f   : > { %v3955_v26 = vpop.f32.mrf.mxu0 }
 0x570   : > { %v3957_v33 = vpop.f32.mrf.mxu1 }
 0x571   : > { %v3959_v41 = vpop.f32.mrf.mxu0 }
 0x572   : > { %v3961_v1 = vpop.f32.mrf.mxu1 }
 0x573   : > { %v3963_v60 = vpop.f32.mrf.mxu0 }
 0x574   : > { %v3965_v11 = vpop.f32.mrf.mxu1 }
 0x575   : > { %v3967_v39 = vpop.f32.mrf.mxu0 }
 0x576   : > { %v3969_v51 = vpop.f32.mrf.mxu1 }
 0x577   : > { %v3971_v46 = vpop.f32.mrf.mxu0 }
 0x578   : > { %v3973_v3 = vpop.f32.mrf.mxu1 }
 0x579   : > { %v3975_v9 = vpop.f32.mrf.mxu0 }
 0x57a   : > { %v3977_v59 = vpop.f32.mrf.mxu1 }
 0x57b   : > { %v3979_v21 = vpop.f32.mrf.mxu0 }
 0x57c   : > { %v3981_v5 = vpop.f32.mrf.mxu1 }
 0x57d   : > { %v3983_v8 = vpop.f32.mrf.mxu0 }
 0x57e   : > { %4344 = vst [vmem:[#allocation14_spill] sm:$0xff] %v3983_v8  ;;  %v3985_v6 = vpop.f32.mrf.mxu1 }
 0x57f   : > { %v3987_v12 = vpop.f32.mrf.mxu0 }
 0x580   : > { %4345 = vst [vmem:[#allocation22_spill] sm:$0xff] %v3987_v12  ;;  %v2139_v19 = vmax.f32 %v3983_v8, %v3987_v12  ;;  %v3991_v28 = vpop.f32.mrf.mxu1  ;;  %v2133_v8 = vmax.f32 %v3967_v39, %v3971_v46 }
 0x581   : > { %v3993_v32 = vpop.f32.mrf.mxu0 }
 0x582   : > { %2140 = vmax.xlane.f32.xlu0 %v2139_v19  ;;  %v3995_v43 = vpop.f32.mrf.mxu1 }
 0x583   : > { %4346 = vst [vmem:[#allocation23_spill] sm:$0xff] %v3995_v43  ;;  %v3997_v37 = vpop.f32.mrf.mxu0  ;;  %v1751_v55 = vmax.f32 %v3991_v28, %v3995_v43  ;;  %v1745_v43 = vmax.f32 %v3973_v3, %v3977_v59 }
 0x584   : > { %4347 = vst [vmem:[#allocation31_spill] sm:$0xff] %v3997_v37  ;;  %v2142_v25 = vmax.f32 %v3993_v32, %v3997_v37  ;;  %v4003_v54 = vpop.f32.mrf.mxu1  ;;  %v2136_v37 = vmax.f32 %v3975_v9, %v3979_v21 }
 0x586   : > { %1752 = vmax.xlane.f32.xlu0 %v1751_v55  ;;  %2143 = vmax.xlane.f32.xlu1 %v2142_v25  ;;  %v4005_v12 = vpop.f32.mrf.mxu1  ;;  %v2127_v55 = vmax.f32 %v3951_v50, %v3955_v26  ;;  %v1748_v25 = vmax.f32 %v3981_v5, %v3985_v6 }
 0x587   : > { %v1754_v19 = vmax.f32 %v4003_v54, %v4005_v12 }
 0x58a   : > { %2134 = vmax.xlane.f32.xlu0 %v2133_v8  ;;  %1755 = vmax.xlane.f32.xlu1 %v1754_v19  ;;  %v1739_v8 = vmax.f32 %v3957_v33, %v3961_v1  ;;  %v2130_v19 = vmax.f32 %v3959_v41, %v3963_v60 }
 0x58e   : > { %1746 = vmax.xlane.f32.xlu0 %v1745_v43  ;;  %2137 = vmax.xlane.f32.xlu1 %v2136_v37  ;;  %v2121_v43 = vmax.f32 %v3935_v48, %v3939_v10  ;;  %v1742_v37 = vmax.f32 %v3965_v11, %v3969_v51 }
 0x592   : > { %2128 = vmax.xlane.f32.xlu0 %v2127_v55  ;;  %1749 = vmax.xlane.f32.xlu1 %v1748_v25  ;;  %v1733_v55 = vmax.f32 %v3941_v42, %v3945_v13  ;;  %v2124_v25 = vmax.f32 %v3943_v44, %v3947_v22 }
 0x596   : > { %1740 = vmax.xlane.f32.xlu0 %v1739_v8  ;;  %2131 = vmax.xlane.f32.xlu1 %v2130_v19  ;;  %v2115_v8 = vmax.f32 %v3919_v53, %v3923_v30  ;;  %v1736_v19 = vmax.f32 %v3949_v17, %v3953_v7 }
 0x59a   : > { %2122 = vmax.xlane.f32.xlu0 %v2121_v43  ;;  %1743 = vmax.xlane.f32.xlu1 %v1742_v37  ;;  %v1727_v43 = vmax.f32 %v3925_v45, %v3929_v15  ;;  %v2118_v37 = vmax.f32 %v3927_v23, %v3931_v34 }
 0x59e   : > { %1734 = vmax.xlane.f32.xlu0 %v1733_v55  ;;  %2125 = vmax.xlane.f32.xlu1 %v2124_v25  ;;  %v2109_v55 = vmax.f32 %v3900_v49, %v3904_v31  ;;  %v1730_v25 = vmax.f32 %v3933_v35, %v3937_v52 }
 0x5a2   : > { %2116 = vmax.xlane.f32.xlu0 %v2115_v8  ;;  %1737 = vmax.xlane.f32.xlu1 %v1736_v19  ;;  %v1721_v8 = vmax.f32 %v3906_v24, %v3913_v38  ;;  %v2112_v19 = vmax.f32 %v3908_v27, %v3915_v40 }
 0x5a6   : > { %1728 = vmax.xlane.f32.xlu0 %v1727_v43  ;;  %2119 = vmax.xlane.f32.xlu1 %v2118_v37  ;;  %v2103_v43 = vmax.f32 %v3882_v20, %v3886_v4  ;;  %v1724_v37 = vmax.f32 %v3917_v47, %v3921_v16 }
 0x5aa   : > { %2110 = vmax.xlane.f32.xlu0 %v2109_v55  ;;  %1731 = vmax.xlane.f32.xlu1 %v1730_v25  ;;  %v1715_v55 = vmax.f32 %v3889_v2, %v3893_v0  ;;  %v2106_v25 = vmax.f32 %v3891_v61, %v3895_v58  ;;  %v4348_v0 = vld [vmem:[#allocation11_spill] sm:$0xff]  ;;  %v4349_v58 = vld [vmem:[#allocation30_spill] sm:$0xff] }
 0x5ae   : > { %1722 = vmax.xlane.f32.xlu0 %v1721_v8  ;;  %2113 = vmax.xlane.f32.xlu1 %v2112_v19  ;;  %v2097_v8 = vmax.f32 %v3866_v57, %v3868_v62  ;;  %v1718_v19 = vmax.f32 %v3898_v29, %v3902_v18  ;;  %v2814_v62 = vld [vmem:[#allocation3 + $0x24] ss:$-16 sps:$4 sm:$0x1f]   ;;  %v4350_v18 = vld [vmem:[#allocation14_spill] sm:$0xff] }
 0x5af   : > { %1914 = vmatprep.mubr.bf16.mxu1 %v2814_v62 }
 0x5b2   : > { %2104 = vmax.xlane.f32.xlu0 %v2103_v43  ;;  %1725 = vmax.xlane.f32.xlu1 %v1724_v37  ;;  %v1709_v43 = vmax.f32 %v3870_v14, %v3874_v56  ;;  %v2100_v37 = vmax.f32 %v3872_v36, %v3876_v63 }
 0x5b6   : > { %1716 = vmax.xlane.f32.xlu0 %v1715_v55  ;;  %2107 = vmax.xlane.f32.xlu1 %v2106_v25  ;;  %v1712_v55 = vmax.f32 %v4349_v58, %v4348_v0  ;;  %v2811_v25 = vld [vmem:[#allocation3 + $0x34] ss:$-8 sps:$4 sm:$0x1f]  }
 0x5b7   : > { %2302 = vmatprep.mubr.bf16.mxu0 %v2811_v25 }
 0x5ba   : > { %2098 = vmax.xlane.f32.xlu0 %v2097_v8  ;;  %1719 = vmax.xlane.f32.xlu1 %v1718_v19  ;;  %v4351_v19 = vld [vmem:[#allocation22_spill] sm:$0xff] }
 0x5be   : > { %1710 = vmax.xlane.f32.xlu0 %v1709_v43  ;;  %2101 = vmax.xlane.f32.xlu1 %v2100_v37  ;;  %v4352_v37 = vld [vmem:[#allocation23_spill] sm:$0xff] }
 0x5c2   : > { %1713 = vmax.xlane.f32.xlu1 %v1712_v55  ;;  %v4353_v55 = vld [vmem:[#allocation31_spill] sm:$0xff] }
 0x60b   : > { %v2141_v57 = vpop.xlane.xlu0 %2140 }
 0x60c   : > { %v2173_v8 = vsub.f32 %v4350_v18, %v2141_v57  ;;  %v2174_v29 = vsub.f32 %v4351_v19, %v2141_v57 }
 0x60e   : > { %v2233_v61 = vmul.f32 1.442695, %v2173_v8  ;;  %v2235_v14 = vmul.f32 1.442695, %v2174_v29 }
 0x60f   : > { %v1753_v56 = vpop.xlane.xlu0 %1752  ;;  %v2144_v2 = vpop.xlane.xlu1 %2143 }
 0x610   : > { %v1785_v43 = vsub.f32 %v3991_v28, %v1753_v56  ;;  %v1786_v63 = vsub.f32 %v4352_v37, %v1753_v56  ;;  %v2175_v0 = vsub.f32 %v3993_v32, %v2144_v2  ;;  %v2176_v58 = vsub.f32 %v4353_v55, %v2144_v2 }
 0x611   : > { %2949 = vpow2.f32 %v2233_v61 }
 0x612   : > { %v1845_v25 = vmul.f32 1.442695, %v1785_v43  ;;  %v1847_v62 = vmul.f32 1.442695, %v1786_v63  ;;  %v2237_v36 = vmul.f32 1.442695, %v2175_v0  ;;  %2951 = vpow2.f32 %v2235_v14 }
 0x613   : > { %v2239_v18 = vmul.f32 1.442695, %v2176_v58  ;;  %v2135_v16 = vpop.xlane.xlu0 %2134  ;;  %v1756_v57 = vpop.xlane.xlu1 %1755 }
 0x614   : > { %2953 = vpow2.f32 %v1845_v25  ;;  %v2169_v29 = vsub.f32 %v3967_v39, %v2135_v16  ;;  %v2170_v8 = vsub.f32 %v3971_v46, %v2135_v16  ;;  %v1787_v28 = vsub.f32 %v4003_v54, %v1756_v57 }
 0x615   : > { %2955 = vpow2.f32 %v1847_v62  ;;  %v1788_v56 = vsub.f32 %v4005_v12, %v1756_v57 }
 0x616   : > { %2957 = vpow2.f32 %v2237_v36  ;;  %v2225_v2 = vmul.f32 1.442695, %v2169_v29  ;;  %v2227_v61 = vmul.f32 1.442695, %v2170_v8  ;;  %v1849_v32 = vmul.f32 1.442695, %v1787_v28 }
 0x617   : > { %2959 = vpow2.f32 %v2239_v18  ;;  %v1851_v63 = vmul.f32 1.442695, %v1788_v56  ;;  %v1747_v14 = vpop.xlane.xlu0 %1746  ;;  %v2138_v0 = vpop.xlane.xlu1 %2137 }
 0x618   : > { %2961 = vpow2.f32 %v2225_v2  ;;  %v1781_v58 = vsub.f32 %v3973_v3, %v1747_v14  ;;  %v1782_v39 = vsub.f32 %v3977_v59, %v1747_v14  ;;  %v2171_v16 = vsub.f32 %v3975_v9, %v2138_v0 }
 0x619   : > { %2963 = vpow2.f32 %v2227_v61  ;;  %v2172_v54 = vsub.f32 %v3979_v21, %v2138_v0 }
 0x61a   : > { %2965 = vpow2.f32 %v1849_v32  ;;  %v1837_v46 = vmul.f32 1.442695, %v1781_v58  ;;  %v1839_v36 = vmul.f32 1.442695, %v1782_v39  ;;  %v2229_v12 = vmul.f32 1.442695, %v2171_v16 }
 0x61b   : > { %2967 = vpow2.f32 %v1851_v63  ;;  %v2231_v19 = vmul.f32 1.442695, %v2172_v54  ;;  %v2129_v43 = vpop.xlane.xlu0 %2128  ;;  %v1750_v37 = vpop.xlane.xlu1 %1749 }
 0x61c   : > { %2969 = vpow2.f32 %v1837_v46  ;;  %v2165_v55 = vsub.f32 %v3951_v50, %v2129_v43  ;;  %v2166_v3 = vsub.f32 %v3955_v26, %v2129_v43  ;;  %v1783_v59 = vsub.f32 %v3981_v5, %v1750_v37 }
 0x61d   : > { %2971 = vpow2.f32 %v1839_v36  ;;  %v1784_v9 = vsub.f32 %v3985_v6, %v1750_v37 }
 0x61e   : > { %2973 = vpow2.f32 %v2229_v12  ;;  %v2217_v21 = vmul.f32 1.442695, %v2165_v55  ;;  %v2219_v25 = vmul.f32 1.442695, %v2166_v3  ;;  %v1841_v62 = vmul.f32 1.442695, %v1783_v59  ;;  %v2950_v18 = vpop.eup %2949 }
 0x61f   : > { %2975 = vpow2.f32 %v2231_v19  ;;  %v1843_v57 = vmul.f32 1.442695, %v1784_v9  ;;  %v1741_v29 = vpop.xlane.xlu0 %1740  ;;  %v2132_v8 = vpop.xlane.xlu1 %2131 }
 0x620   : > { %v2952_v28 = vpop.eup %2951  ;;  %2977 = vpow2.f32 %v2217_v21  ;;  %v1777_v50 = vsub.f32 %v3957_v33, %v1741_v29  ;;  %v1778_v26 = vsub.f32 %v3961_v1, %v1741_v29  ;;  %v2167_v5 = vsub.f32 %v3959_v41, %v2132_v8 }
 0x621   : > { %v2954_v56 = vpop.eup %2953  ;;  %2979 = vpow2.f32 %v2219_v25  ;;  %v2168_v6 = vsub.f32 %v3963_v60, %v2132_v8 }
 0x622   : > { %v2956_v2 = vpop.eup %2955  ;;  %2981 = vpow2.f32 %v1841_v62  ;;  %v1829_v61 = vmul.f32 1.442695, %v1777_v50  ;;  %v1831_v32 = vmul.f32 1.442695, %v1778_v26  ;;  %v2221_v63 = vmul.f32 1.442695, %v2167_v5 }
 0x623   : > { %v2958_v14 = vpop.eup %2957  ;;  %2983 = vpow2.f32 %v1843_v57  ;;  %v2223_v0 = vmul.f32 1.442695, %v2168_v6  ;;  %v2123_v58 = vpop.xlane.xlu0 %2122 }
 0x624   : > { %v1744_v39 = vpop.xlane.xlu1 %1743  ;;  %v2960_v16 = vpop.eup %2959  ;;  %2985 = vpow2.f32 %v1829_v61  ;;  %v2161_v33 = vsub.f32 %v3935_v48, %v2123_v58  ;;  %v2162_v41 = vsub.f32 %v3939_v10, %v2123_v58  ;;  %v2255_v36 = vpack.c.bf16 %v2958_v14, %v2950_v18 }
 0x625   : > { %v1779_v1 = vsub.f32 %v3965_v11, %v1744_v39  ;;  %v2962_v54 = vpop.eup %2961  ;;  %2987 = vpow2.f32 %v1831_v32  ;;  %v1780_v60 = vsub.f32 %v3969_v51, %v1744_v39  ;;  %v2256_v46 = vpack.c.bf16 %v2960_v16, %v2952_v28 }
 0x626   : > { %v2964_v12 = vpop.eup %2963  ;;  %2989 = vpow2.f32 %v2221_v63  ;;  %v2209_v19 = vmul.f32 1.442695, %v2161_v33  ;;  %v2211_v43 = vmul.f32 1.442695, %v2162_v41 }
 0x627   : > { %v1833_v37 = vmul.f32 1.442695, %v1779_v1  ;;  %v2966_v55 = vpop.eup %2965  ;;  %2991 = vpow2.f32 %v2223_v0  ;;  %v1835_v3 = vmul.f32 1.442695, %v1780_v60  ;;  %2270 = vmatprep.subr.bf16.mxu0 %v2256_v46  ;;  %v1735_v48 = vpop.xlane.xlu0 %1734 }
 0x628   : > { %v2126_v59 = vpop.xlane.xlu1 %2125  ;;  %v2968_v10 = vpop.eup %2967  ;;  %2993 = vpow2.f32 %v2209_v19  ;;  %2271 = vmatpush1.bf16.xpose.msra.mxu0 %v2255_v36  ;;  %v1773_v11 = vsub.f32 %v3941_v42, %v1735_v48  ;;  %v1774_v51 = vsub.f32 %v3945_v13, %v1735_v48  ;;  %v1867_v18 = vpack.c.bf16 %v2966_v55, %v2954_v56 }
 0x629   : > { %v2163_v9 = vsub.f32 %v3943_v44, %v2126_v59  ;;  %v2970_v21 = vpop.eup %2969  ;;  %2995 = vpow2.f32 %v2211_v43  ;;  %v2164_v25 = vsub.f32 %v3947_v22, %v2126_v59  ;;  %v1868_v62 = vpack.c.bf16 %v2968_v10, %v2956_v2 }
 0x62a   : > { %v2972_v57 = vpop.eup %2971  ;;  %2997 = vpow2.f32 %v1833_v37  ;;  %v1821_v29 = vmul.f32 1.442695, %v1773_v11  ;;  %v1823_v8 = vmul.f32 1.442695, %v1774_v51 }
 0x62b   : > { %v2213_v28 = vmul.f32 1.442695, %v2163_v9  ;;  %v2974_v50 = vpop.eup %2973  ;;  %2999 = vpow2.f32 %v1835_v3  ;;  %v2215_v26 = vmul.f32 1.442695, %v2164_v25  ;;  %1882 = vmatprep.subr.bf16.mxu1 %v1868_v62  ;;  %v2117_v42 = vpop.xlane.xlu0 %2116 }
 0x62c   : > { %v1738_v5 = vpop.xlane.xlu1 %1737  ;;  %v2976_v13 = vpop.eup %2975  ;;  %3001 = vpow2.f32 %v1821_v29  ;;  %1883 = vmatpush1.bf16.xpose.msra.mxu1 %v1867_v18  ;;  %v2157_v44 = vsub.f32 %v3919_v53, %v2117_v42  ;;  %v2158_v22 = vsub.f32 %v3923_v30, %v2117_v42  ;;  %v2253_v32 = vpack.c.bf16 %v2974_v50, %v2962_v54 }
 0x62d   : > { %v1775_v56 = vsub.f32 %v3949_v17, %v1738_v5  ;;  %v2978_v6 = vpop.eup %2977  ;;  %3003 = vpow2.f32 %v1823_v8  ;;  %v1776_v2 = vsub.f32 %v3953_v7, %v1738_v5  ;;  %v2254_v61 = vpack.c.bf16 %v2976_v13, %v2964_v12 }
 0x62e   : > { %v2980_v63 = vpop.eup %2979  ;;  %3005 = vpow2.f32 %v2213_v28  ;;  %v2201_v14 = vmul.f32 1.442695, %v2157_v44  ;;  %v2203_v0 = vmul.f32 1.442695, %v2158_v22 }
 0x62f   : > { %v1825_v58 = vmul.f32 1.442695, %v1775_v56  ;;  %v2982_v39 = vpop.eup %2981  ;;  %3007 = vpow2.f32 %v2215_v26  ;;  %v1827_v16 = vmul.f32 1.442695, %v1776_v2  ;;  %2272 = vmatprep.subr.bf16.mxu0 %v2254_v61  ;;  %v1729_v53 = vpop.xlane.xlu0 %1728 }
 0x630   : > { %v2120_v33 = vpop.xlane.xlu1 %2119  ;;  %v2984_v30 = vpop.eup %2983  ;;  %3009 = vpow2.f32 %v2201_v14  ;;  %2273 = vmatpush1.bf16.xpose.msra.mxu0 %v2253_v32  ;;  %v1769_v17 = vsub.f32 %v3925_v45, %v1729_v53  ;;  %v1770_v7 = vsub.f32 %v3929_v15, %v1729_v53  ;;  %v1865_v46 = vpack.c.bf16 %v2982_v39, %v2970_v21 }
 0x631   : > { %v2159_v41 = vsub.f32 %v3927_v23, %v2120_v33  ;;  %v2986_v1 = vpop.eup %2985  ;;  %3011 = vpow2.f32 %v2203_v0  ;;  %v2160_v54 = vsub.f32 %v3931_v34, %v2120_v33  ;;  %v1866_v60 = vpack.c.bf16 %v2984_v30, %v2972_v57 }
 0x632   : > { %v2988_v36 = vpop.eup %2987  ;;  %3013 = vpow2.f32 %v1825_v58  ;;  %v1813_v12 = vmul.f32 1.442695, %v1769_v17  ;;  %v1815_v19 = vmul.f32 1.442695, %v1770_v7 }
 0x633   : > { %v2205_v43 = vmul.f32 1.442695, %v2159_v41  ;;  %v2990_v37 = vpop.eup %2989  ;;  %3015 = vpow2.f32 %v1827_v16  ;;  %v2207_v55 = vmul.f32 1.442695, %v2160_v54  ;;  %1884 = vmatprep.subr.bf16.mxu1 %v1866_v60  ;;  %v2111_v45 = vpop.xlane.xlu0 %2110  ;;  %v4357_v60 = vld [vmem:[#allocation18_spill] sm:$0xff] }
 0x634   : > { %v1732_v3 = vpop.xlane.xlu1 %1731  ;;  %v2992_v15 = vpop.eup %2991  ;;  %3017 = vpow2.f32 %v1813_v12  ;;  %1885 = vmatpush1.bf16.xpose.msra.mxu1 %v1865_v46  ;;  %v2153_v23 = vsub.f32 %v3900_v49, %v2111_v45  ;;  %v2154_v34 = vsub.f32 %v3904_v31, %v2111_v45  ;;  %v2251_v51 = vpack.c.bf16 %v2990_v37, %v2978_v6  ;;  %v4358_v12 = vld [vmem:[#allocation26_spill] sm:$0xff] }
 0x635   : > { %v1771_v48 = vsub.f32 %v3933_v35, %v1732_v3  ;;  %v2994_v59 = vpop.eup %2993  ;;  %3019 = vpow2.f32 %v1815_v19  ;;  %v1772_v10 = vsub.f32 %v3937_v52, %v1732_v3  ;;  %v2252_v11 = vpack.c.bf16 %v2992_v15, %v2980_v63  ;;  %v4354_v63 = vld [vmem:[#allocation13_spill] sm:$0xff] }
 0x636   : > { %v2996_v9 = vpop.eup %2995  ;;  %3021 = vpow2.f32 %v2205_v43  ;;  %v2193_v21 = vmul.f32 1.442695, %v2153_v23  ;;  %v2195_v25 = vmul.f32 1.442695, %v2154_v34 }
 0x637   : > { %v1817_v62 = vmul.f32 1.442695, %v1771_v48  ;;  %v2998_v18 = vpop.eup %2997  ;;  %3023 = vpow2.f32 %v2207_v55  ;;  %v1819_v57 = vmul.f32 1.442695, %v1772_v10  ;;  %2274 = vmatprep.subr.bf16.mxu0 %v2252_v11  ;;  %v1723_v49 = vpop.xlane.xlu0 %1722  ;;  %v4359_v11 = vld [vmem:[#allocation28_spill] sm:$0xff] }
 0x638   : > { %v2114_v29 = vpop.xlane.xlu1 %2113  ;;  %v3000_v31 = vpop.eup %2999  ;;  %3025 = vpow2.f32 %v2193_v21  ;;  %2275 = vmatpush1.bf16.xpose.msra.mxu0 %v2251_v51  ;;  %v1765_v35 = vsub.f32 %v3906_v24, %v1723_v49  ;;  %v1766_v52 = vsub.f32 %v3913_v38, %v1723_v49  ;;  %v1863_v42 = vpack.c.bf16 %v2998_v18, %v2986_v1  ;;  %v4356_v1 = vld [vmem:[#allocation12_spill] sm:$0xff] }
 0x639   : > { %v2155_v8 = vsub.f32 %v3908_v27, %v2114_v29  ;;  %v3002_v28 = vpop.eup %3001  ;;  %3027 = vpow2.f32 %v2195_v25  ;;  %v2156_v50 = vsub.f32 %v3915_v40, %v2114_v29  ;;  %v1864_v26 = vpack.c.bf16 %v3000_v31, %v2988_v36  ;;  %v4361_v25 = vld [vmem:[#allocation27_spill] sm:$0xff] }
 0x63a   : > { %v3004_v5 = vpop.eup %3003  ;;  %3029 = vpow2.f32 %v1817_v62  ;;  %v1805_v13 = vmul.f32 1.442695, %v1765_v35  ;;  %v1807_v44 = vmul.f32 1.442695, %v1766_v52 }
 0x63b   : > { %v2197_v22 = vmul.f32 1.442695, %v2155_v8  ;;  %v3006_v56 = vpop.eup %3005  ;;  %3031 = vpow2.f32 %v1819_v57  ;;  %v2199_v6 = vmul.f32 1.442695, %v2156_v50  ;;  %1886 = vmatprep.subr.bf16.mxu1 %v1864_v26  ;;  %v2105_v24 = vpop.xlane.xlu0 %2104  ;;  %v4362_v57 = vld [vmem:[#allocation20_spill] sm:$0xff] }
 0x63c   : > { %v1726_v2 = vpop.xlane.xlu1 %1725  ;;  %v3008_v38 = vpop.eup %3007  ;;  %3033 = vpow2.f32 %v1805_v13  ;;  %1887 = vmatpush1.bf16.xpose.msra.mxu1 %v1863_v42  ;;  %v2149_v27 = vsub.f32 %v3882_v20, %v2105_v24  ;;  %v2150_v40 = vsub.f32 %v3886_v4, %v2105_v24  ;;  %v2249_v58 = vpack.c.bf16 %v3006_v56, %v2994_v59  ;;  %v4364_v56 = vld [vmem:[#allocation19_spill] sm:$0xff] }
 0x63d   : > { %v1767_v61 = vsub.f32 %v3917_v47, %v1726_v2  ;;  %v3010_v32 = vpop.eup %3009  ;;  %3035 = vpow2.f32 %v1807_v44  ;;  %v1768_v14 = vsub.f32 %v4354_v63, %v1726_v2  ;;  %v2250_v0 = vpack.c.bf16 %v3008_v38, %v2996_v9  ;;  %v4355_v47 = vld [vmem:[#allocation17_spill] sm:$0xff]  ;;  %v4360_v9 = vld [vmem:[#allocation15_spill] sm:$0xff]  ;;  %v4363_v44 = vld [vmem:[#allocation24_spill] sm:$0xff] }
 0x63e   : > { %v3012_v39 = vpop.eup %3011  ;;  %3037 = vpow2.f32 %v2197_v22  ;;  %v2185_v16 = vmul.f32 1.442695, %v2149_v27  ;;  %v2187_v53 = vmul.f32 1.442695, %v2150_v40  ;;  %v4365_v2 = vld [vmem:[#allocation25_spill] sm:$0xff] }
 0x63f   : > { %v1809_v33 = vmul.f32 1.442695, %v1767_v61  ;;  %v3014_v30 = vpop.eup %3013  ;;  %3039 = vpow2.f32 %v2199_v6  ;;  %v1811_v17 = vmul.f32 1.442695, %v1768_v14  ;;  %2276 = vmatprep.subr.bf16.mxu0 %v2250_v0  ;;  %v1717_v20 = vpop.xlane.xlu0 %1716 }
 0x640   : > { %v2108_v7 = vpop.xlane.xlu1 %2107  ;;  %v3016_v4 = vpop.eup %3015  ;;  %3041 = vpow2.f32 %v2185_v16  ;;  %2277 = vmatpush1.bf16.xpose.msra.mxu0 %v2249_v58  ;;  %v1761_v41 = vsub.f32 %v4355_v47, %v1717_v20  ;;  %v1762_v54 = vsub.f32 %v4356_v1, %v1717_v20  ;;  %v1861_v37 = vpack.c.bf16 %v3014_v30, %v3002_v28 }
 0x641   : > { %v2151_v46 = vsub.f32 %v4357_v60, %v2108_v7  ;;  %v3018_v36 = vpop.eup %3017  ;;  %3043 = vpow2.f32 %v2187_v53  ;;  %v2152_v19 = vsub.f32 %v4358_v12, %v2108_v7  ;;  %v1862_v43 = vpack.c.bf16 %v3016_v4, %v3004_v5 }
 0x642   : > { %v3020_v55 = vpop.eup %3019  ;;  %3045 = vpow2.f32 %v1809_v33  ;;  %v1797_v45 = vmul.f32 1.442695, %v1761_v41  ;;  %v1799_v10 = vmul.f32 1.442695, %v1762_v54  ;;  %v4367_v33 = vld [vmem:[#allocation30_spill] sm:$0xff] }
 0x643   : > { %v2189_v3 = vmul.f32 1.442695, %v2151_v46  ;;  %v3022_v15 = vpop.eup %3021  ;;  %3047 = vpow2.f32 %v1811_v17  ;;  %v2191_v23 = vmul.f32 1.442695, %v2152_v19  ;;  %1888 = vmatprep.subr.bf16.mxu1 %v1862_v43  ;;  %v2099_v34 = vpop.xlane.xlu0 %2098  ;;  %v4368_v17 = vld [vmem:[#allocation11_spill] sm:$0xff] }
 0x644   : > { %v1720_v48 = vpop.xlane.xlu1 %1719  ;;  %v3024_v59 = vpop.eup %3023  ;;  %1889 = vmatpush1.bf16.xpose.msra.mxu1 %v1861_v37  ;;  %v2145_v51 = vsub.f32 %v4359_v11, %v2099_v34  ;;  %v2146_v21 = vsub.f32 %v4360_v9, %v2099_v34  ;;  %3049 = vpow2.f32 %v1797_v45  ;;  %v2247_v31 = vpack.c.bf16 %v3022_v15, %v3010_v32  ;;  %v4366_v32 = vld [vmem:[#allocation16_spill] sm:$0xff] }
 0x645   : > { %v1763_v62 = vsub.f32 %v4361_v25, %v1720_v48  ;;  %v3026_v18 = vpop.eup %3025  ;;  %v1764_v49 = vsub.f32 %v4362_v57, %v1720_v48  ;;  %v2248_v29 = vpack.c.bf16 %v3024_v59, %v3012_v39  ;;  %3051 = vpow2.f32 %v2189_v3 }
 0x646   : > { %v3028_v35 = vpop.eup %3027  ;;  %v2177_v52 = vmul.f32 1.442695, %v2145_v51  ;;  %3053 = vpow2.f32 %v2191_v23  ;;  %v2179_v13 = vmul.f32 1.442695, %v2146_v21 }
 0x647   : > { %v1801_v8 = vmul.f32 1.442695, %v1763_v62  ;;  %v3030_v28 = vpop.eup %3029  ;;  %v1803_v50 = vmul.f32 1.442695, %v1764_v49  ;;  %2278 = vmatprep.subr.bf16.mxu0 %v2248_v29  ;;  %v1711_v26 = vpop.xlane.xlu0 %1710  ;;  %3055 = vpow2.f32 %v1799_v10 }
 0x648   : > { %v2102_v42 = vpop.xlane.xlu1 %2101  ;;  %v3032_v5 = vpop.eup %3031  ;;  %2279 = vmatpush1.bf16.xpose.msra.mxu0 %v2247_v31  ;;  %v1758_v22 = vsub.f32 %v4363_v44, %v1711_v26  ;;  %3057 = vpow2.f32 %v2177_v52  ;;  %v1859_v40 = vpack.c.bf16 %v3030_v28, %v3018_v36  ;;  %v1757_v63 = vsub.f32 %v4366_v32, %v1711_v26  ;;  %v2812_v52 = vld [vmem:[#allocation3 + $0x20] ss:$-16 sps:$4 sm:$0x1f]   ;;  %v2335_v28 = vld [vmem:[%s4226_s5 + $0x8] sm:$0xff] }
 0x649   : > { %v2147_v6 = vsub.f32 %v4364_v56, %v2102_v42  ;;  %v3034_v24 = vpop.eup %3033  ;;  %v2148_v38 = vsub.f32 %v4365_v2, %v2102_v42  ;;  %v1860_v27 = vpack.c.bf16 %v3032_v5, %v3020_v55  ;;  %3059 = vpow2.f32 %v1801_v8  ;;  %v2815_v8 = vld [vmem:[%s4225_s4] sm:$0xff]   ;;  %2345 = vperm.xlu1 %2792, %v2335_v28   ;;  %v2336_v26 = vld [vmem:[%s4226_s5 + $0x10] sm:$0xff]  ;;  %v2337_v42 = vld [vmem:[%s4226_s5 + $0x18] sm:$0xff] }
 0x64a   : > { %v3036_v61 = vpop.eup %3035  ;;  %v1791_v14 = vmul.f32 1.442695, %v1758_v22  ;;  %3061 = vpow2.f32 %v1803_v50  ;;  %v1789_v1 = vmul.f32 1.442695, %v1757_v63  ;;  %v2334_v50 = vld [vmem:[%s4226_s5] sm:$0xff] }
 0x64b   : > { %v2181_v0 = vmul.f32 1.442695, %v2147_v6  ;;  %v3038_v58 = vpop.eup %3037  ;;  %v2183_v39 = vmul.f32 1.442695, %v2148_v38  ;;  %1890 = vmatprep.subr.bf16.mxu1 %v1860_v27  ;;  %3063 = vpow2.f32 %v2179_v13  ;;  %2340 = vperm.xlu0 %2791, %v2334_v50   ;;  %v4369_v27 = vld [vmem:[#allocation29_spill] sm:$0xff] }
 0x64c   : > { %v1714_v16 = vpop.xlane.xlu1 %1713  ;;  %v3040_v53 = vpop.eup %3039  ;;  %1891 = vmatpush1.bf16.xpose.msra.mxu1 %v1859_v40  ;;  %v2245_v7 = vpack.c.bf16 %v3038_v58, %v3026_v18  ;;  %3065 = vpow2.f32 %v1791_v14 }
 0x64d   : > { %v1759_v30 = vsub.f32 %v4367_v33, %v1714_v16  ;;  %v1760_v20 = vsub.f32 %v4368_v17, %v1714_v16  ;;  %v3042_v4 = vpop.eup %3041  ;;  %v2246_v47 = vpack.c.bf16 %v3040_v53, %v3028_v35  ;;  %3067 = vpow2.f32 %v2181_v0  ;;  %v2809_v35 = vld [vmem:[#allocation3 + $0x30] ss:$-8 sps:$4 sm:$0x1f]   ;;  %2350 = vperm.xlu1 %2792, %v2336_v26  }
 0x64e   : > { %v3044_v41 = vpop.eup %3043  ;;  %3069 = vpow2.f32 %v2183_v39  ;;  %v4370_v53 = vld [vmem:[#allocation21_spill] sm:$0xff]  ;;  %v2816_v33 = vld [vmem:[%s4225_s4 + $0x8] sm:$0xff]  }
 0x64f   : > { %v1793_v54 = vmul.f32 1.442695, %v1759_v30  ;;  %v1795_v60 = vmul.f32 1.442695, %v1760_v20  ;;  %v3046_v46 = vpop.eup %3045  ;;  %2280 = vmatprep.subr.bf16.mxu0 %v2246_v47 }
 0x650   : > { %v3048_v36 = vpop.eup %3047  ;;  %2281 = vmatpush1.bf16.xpose.msra.mxu0 %v2245_v7  ;;  %v1857_v12 = vpack.c.bf16 %v3046_v46, %v3034_v24 }
 0x651   : > { %3071 = vpow2.f32 %v1793_v54  ;;  %v1858_v19 = vpack.c.bf16 %v3048_v36, %v3036_v61  ;;  %v3050_v43 = vpop.eup %3049  ;;  %2355 = vperm.xlu1 %2792, %v2337_v42  }
 0x652   : > { %3073 = vpow2.f32 %v1795_v60  ;;  %v3052_v37 = vpop.eup %3051 }
 0x653   : > { %3075 = vpow2.f32 %v1789_v1  ;;  %1892 = vmatprep.subr.bf16.mxu1 %v1858_v19  ;;  %v3054_v55 = vpop.eup %3053  ;;  %v2243_v45 = vpack.c.bf16 %v3052_v37, %v3042_v4 }
 0x654   : > { %1893 = vmatpush1.bf16.xpose.msra.mxu1 %v1857_v12  ;;  %v3056_v3 = vpop.eup %3055  ;;  %v2244_v15 = vpack.c.bf16 %v3054_v55, %v3044_v41 }
 0x655   : > { %v3058_v23 = vpop.eup %3057 }
 0x656   : > { %v3060_v34 = vpop.eup %3059  ;;  %2282 = vmatprep.subr.bf16.mxu0 %v2244_v15 }
 0x657   : > { %v3062_v48 = vpop.eup %3061  ;;  %v1855_v59 = vpack.c.bf16 %v3060_v34, %v3050_v43 }
 0x658   : > { %2283 = vmatpush1.bf16.xpose.msra.mxu0 %v2243_v45  ;;  %v3064_v10 = vpop.eup %3063  ;;  %v1856_v11 = vpack.c.bf16 %v3062_v48, %v3056_v3 }
 0x659   : > { %v3066_v51 = vpop.eup %3065 }
 0x65a   : > { %v3068_v9 = vpop.eup %3067  ;;  %1894 = vmatprep.subr.bf16.mxu1 %v1856_v11 }
 0x65b   : > { %v3070_v21 = vpop.eup %3069  ;;  %v2241_v25 = vpack.c.bf16 %v3068_v9, %v3058_v23 }
 0x65c   : > { %1895 = vmatpush1.bf16.xpose.msra.mxu1 %v1855_v59  ;;  %v2242_v18 = vpack.c.bf16 %v3070_v21, %v3064_v10 }
 0x65e   : > { %v3072_v62 = vpop.eup %3071  ;;  %2284 = vmatprep.subr.bf16.mxu0 %v2242_v18 }
 0x65f   : > { %v3074_v57 = vpop.eup %3073 }
 0x660   : > { %v3076_v49 = vpop.eup %3075  ;;  %v1854_v29 = vpack.c.bf16 %v3074_v57, %v3066_v51  ;;  %2285 = vmatpush1.bf16.xpose.msra.mxu0 %v2241_v25 }
 0x661   : > { %v1853_v31 = vpack.c.bf16 %v3072_v62, %v3076_v49 }
 0x662   : > { %1896 = vmatprep.subr.bf16.mxu1 %v1854_v29 }
 0x664   : > { %1897 = vmatpush1.bf16.xpose.msra.mxu1 %v1853_v31 }
 0x667   : > { %2303 = vmatmul.mubr.bf16.vlgmr.msra.gmra.mxu0 %v2809_v35 }
 0x66b   : > { %1915 = vmatmul.mubr.bf16.vlgmr.msra.gmra.mxu1 %v2812_v52 }
 0x66c   : > { %2688 = vmatprep.mubr.msk.bf16.mxu1 %vm664_vm8, %v2815_v8 }
 0x6c4   : > { %v2346_v30 = vpop.permute.xlu1 %2345 }
 0x6c6   : > { %v2341_v7 = vpop.permute.xlu0 %2340 }
 0x6c8   : > { %v2351_v17 = vpop.permute.xlu1 %2350 }
 0x6cc   : > { %v2356_v1 = vpop.permute.xlu1 %2355 }
 0x727   : > { %v2304_v5 = vpop.f32.mrf.mxu0 }
 0x729   : > { %v2306_v13 = vpop.f32.mrf.mxu0 }
 0x72b   : > { %v1916_v44 = vpop.f32.mrf.mxu1  ;;  %v2307_v22 = vpop.f32.mrf.mxu0 }
 0x72c   : > { %3077 = vrcp.f32 %v2307_v22 }
 0x72d   : > { %v1918_v56 = vpop.f32.mrf.mxu1  ;;  %v2309_v6 = vpop.f32.mrf.mxu0 }
 0x72f   : > { %v1919_v24 = vpop.f32.mrf.mxu1 }
 0x730   : > { %3079 = vrcp.f32 %v1919_v24 }
 0x731   : > { %v1921_v2 = vpop.f32.mrf.mxu1 }
 0x739   : > { %v3078_v38 = vpop.eup %3077 }
 0x73a   : > { %v2315_v40 = vrot.slane %v3078_v38, %v4369_v27 }
 0x73c   : > { %v2316_v61 = vmul.f32 %v2315_v40, %v2304_v5 }
 0x73d   : > { %v3080_v32 = vpop.eup %3079 }
 0x73e   : > { %v1927_v63 = vrot.slane %v3080_v32, %v4369_v27  ;;  %v2317_v14 = vpack.c.bf16 %v2316_v61, %v2316_v61 }
 0x740   : > { %v1928_v0 = vmul.f32 %v1927_v63, %v1916_v44  ;;  %v2321_v39 = vrot.slane %v2317_v14, 4 }
 0x742   : > { %v1929_v58 = vpack.c.bf16 %v1928_v0, %v1928_v0 }
 0x744   : > { %v2328_v16 = vsel %vm814_vm9, %v1929_v58, %v2321_v39 }
 0x745   : > { %2684 = vmatprep.subr.bf16.mxu1 %v2328_v16 }
 0x746   : > { %2685 = vmatpush3.bf16.msra.mxu1 %v2328_v16 }
 0x747   : > { %2686 = vmatprep.subr.bf16.mxu1 %v4370_v53 }
 0x74a   : > { %2687 = vmatpush3.bf16.msra.mxu1 %v4370_v53 }
 0x74d   : > { %2689 = vmatmul.mubr.msk.bf16.vlgmr.msra.gmra.mxu1 %vm664_vm8, %v2816_v33 }
 0x80d   : > { %v2690_v20 = vpop.f32.mrf.mxu1 }
 0x80e   : > { %v2417_v4 = vadd.f32 %v2690_v20, %v2351_v17 }
 0x80f   : > { %v2408_v47 = vpop.f32.mrf.mxu1 }
 0x810   : > { %2425 = vst [vmem:[%s3435_s14 + $0x10] sm:$0xff] %v2417_v4  ;;  %v2409_v41 = vadd.f32 %v2408_v47, %v2341_v7 }
 0x811   : > { %v2691_v54 = vpop.f32.mrf.mxu1 }
 0x812   : > { %2423 = vst [vmem:[%s3435_s14] sm:$0xff] %v2409_v41  ;;  %v2420_v60 = vadd.f32 %v2691_v54, %v2356_v1 }
 0x813   : > { %v2411_v46 = vpop.f32.mrf.mxu1 }
 0x814   : > { %2426 = vst [vmem:[%s3435_s14 + $0x18] sm:$0xff] %v2420_v60  ;;  %v2412_v36 = vadd.f32 %v2411_v46, %v2346_v30 }
 0x816   : > { %2424 = vst [vmem:[%s3435_s14 + $0x8] sm:$0xff] %v2412_v36 }
 0x817   : > { %3120 = shalt.err (!%p3117_p6)
}
 0x818   : > { %s3121_s14 = scalar_lea.hbm %s4162_s24, 512  ;;  %s3125_s8 = scalar_lea.hbm %s4227_s6, 2048 }
 0x819   : > { %p3122_p7 = scmp.ne.s32.totalorder %s4162_s24, %s3121_s14  ;;  %p3126_p13 = scmp.lt.s32.totalorder %s4162_s24, %s4227_s6 }
 0x81a   : > { %p3127_p10 = scmp.lt.s32.totalorder %s3125_s8, %s3121_s14 }
 0x81b   : > { %p3123_p9 = pnand %p3122_p7, %p3301_p3 }
 0x81c   : > { %p3128_p12 = por %p3127_p10, %p3126_p13 }
 0x81d   : > { %p3124_p11 = pneg %p3123_p9 }
 0x81f   : > { %p3129_p0 = pnand %p3128_p12, %p3124_p11 }
 0x821   : > { %3132 = shalt.err (!%p3129_p0)
}
 0x822   : > { %s3211_s29 = smov 128   ;;  %s3212_s25 = smov 256  }
 0x823   : > { %s3213_s19 = smov 8  }
 0x824   : > { %2700 = dma.vmem_to_hbm [thread:$0]  (%p3301_p3), %s4164_s20, 512, %s4162_s24, %s4170_s30, %s3211_s29, %s3212_s25, %s3213_s19  }
 0x825 PF: > { %p2712_p1 = scmp.ge.s32.totalorder %s3203_s28, 2  ;;  %s2457_s9 = sand.u32 1, %s3175_s21  }
 0x826   : > { %s2458_s10 = scalar_lea.sflag [#allocation6], %s2457_s9 }
 0x827   : > { %p2707_p2 = pnand %p2712_p1, %p3310_p8 }
 0x829   : > { %p2708_p4 = pneg %p2707_p2 }
 0x82b   : > { %3170 = dma.done.wait (%p2708_p4), %s2458_s10, 512  }
 0x82c   : > { %3172 = vsyncadd (%p2708_p4), %s2458_s10, 4294966784  ;;  %s20_s28 = sadd.s32 1, %s3203_s28   ;;  %s4372_s11 = sld [smem:[#allocation10_spill]] }
 0x82d   : > { %p17_p5 = scmp.ge.s32.totalorder %s20_s28, 6   ;;  %s4373_s21 = smov %s3179_s22 }
 0x82e   : > { %s4374_s22 = smov %s3183_s23  ;;  %s4375_s23 = smov %s3328_s17 }
 0x82f   : > { %s4376_s24 = smov %s3195_s26  ;;  %s4377_s25 = smov %s3199_s27 }
 0x830   : > { %s4378_s26 = smov %s4381_s7  ;;  %19 = sbr.rel (!%p17_p5) target bundleno = 9 (0x9), region = 103 }
 0x832   : > { %s4379_s27 = smov %s4372_s11 }
 0x835   :  { %2463 = vsyncpa [#allocation5], 1 }
 0x836   :  { %2465 = vsyncpa [#allocation5 + $0x1], 1 }
 0x837   :  { %2466 = vsyncpa [#allocation6], 1 }
 0x838   :  { %2468 = vsyncpa [#allocation6 + $0x1], 1 }

</bundles_post_ra>
